<compile_context>
chip_gen: v5e
topology: v5e:2x2
jax: 0.10.0
libtpu: 0.0.40
codegen_flags: <defaults>
</compile_context>

<pallas_src>
import functools
import math

import numpy as np
import jax
import jax.numpy as jnp
from jax.experimental import pallas as pl
from jax.experimental.pallas import tpu as pltpu

EPS = 1e-5


# ------------------------- fused Pallas kernel -------------------------------

def _res_block_kernel(x_ref, w1_ref, w2_ref, g1_ref, b1_ref, g2_ref, b2_ref,
                      o_ref, pad_ref, *, H, W, C, B, HALO):
    """Fused conv+IN+ReLU+conv+IN+residual for a block of B samples.

    x_ref  : (B, C, L)   compact lane-dense activations, L = H*W
    w*_ref : (9, C, C)   per-tap conv matrices, tap index t = dy*3 + dx
    g*/b*  : (C, 1)      InstanceNorm affine params
    o_ref  : (B, C, L)   output (compact, lane-dense)
    pad_ref: (C, Pp)     scratch with HALO zero rows above/below the image,
                         Pp = (H + 2*HALO) * W, reused by both conv stages.
    """
    L = H * W
    p0 = HALO * W                       # flat offset of image row 0 in scratch
    Pp = (H + 2 * HALO) * W
    inv_n = 1.0 / float(L)

    # Zero only the halo rows (tiny), every step.  Not guarded by
    # program_id==0: under megacore grid splitting the second core never runs
    # step 0 and has its own (uninitialized) scratch.
    pad_ref[:, :p0] = jnp.zeros((C, p0), jnp.float32)
    pad_ref[:, p0 + L:Pp] = jnp.zeros((C, Pp - p0 - L), jnp.float32)

    # Column-wrap masks for the dx = -1 / +1 taps (pure function of indices).
    col = jax.lax.broadcasted_iota(jnp.int32, (1, L), 1) % W
    mask_l = (col != 0).astype(jnp.float32)        # invalid where j == 0
    mask_r = (col != W - 1).astype(jnp.float32)    # invalid where j == W - 1

    # Hoist grid-invariant loads out of the per-sample loop.
    w1_taps = [w1_ref[t] for t in range(9)]
    w2_taps = [w2_ref[t] for t in range(9)]
    g1, b1 = g1_ref[...], b1_ref[...]
    g2, b2 = g2_ref[...], b2_ref[...]

    def conv(w_taps):
        # 9 per-tap accumulating matmuls: no (9C, L) im2col temp in VMEM.
        acc = None
        for t in range(9):
            oy, ox = t // 3 - 1, t % 3 - 1
            d = oy * W + ox
            tap = pad_ref[:, p0 + d: p0 + d + L]          # (C, L) shifted view
            if ox == -1:
                tap = tap * mask_l
            elif ox == 1:
                tap = tap * mask_r
            term = jnp.dot(w_taps[t], tap, preferred_element_type=jnp.float32)
            acc = term if acc is None else acc + term
        return acc

    def inorm(y, gamma, beta):
        # Single-pass per-channel stats in f32; gamma folded into the rsqrt
        # scale, beta into one FMA.  No mask needed: every lane is a pixel.
        s1 = jnp.sum(y, axis=1, keepdims=True)            # (C, 1)
        s2 = jnp.sum(y * y, axis=1, keepdims=True)        # (C, 1)
        mean = s1 * inv_n
        var = s2 * inv_n - mean * mean
        scale = gamma * jax.lax.rsqrt(var + EPS)
        shift = beta - mean * scale
        return y * scale + shift

    for s in range(B):                                     # static unroll
        x = x_ref[s]                                       # (C, L)

        # ---- stage 1: conv3x3 + IN + ReLU ----
        pad_ref[:, p0:p0 + L] = x
        y1 = jnp.maximum(inorm(conv(w1_taps), g1, b1), 0.0)

        # ---- stage 2: conv3x3 + IN + residual add ----
        pad_ref[:, p0:p0 + L] = y1                         # reuse same scratch
        y2 = inorm(conv(w2_taps), g2, b2)

        o_ref[s] = x + y2


# ------------------------- wrapper --------------------------------------------

def _taps(w_oihw):
    """(Cout, Cin, 3, 3) -> (9, Cout, Cin), tap index t = dy*3 + dx."""
    c_out, c_in = w_oihw.shape[0], w_oihw.shape[1]
    return jnp.transpose(w_oihw, (2, 3, 0, 1)).reshape(9, c_out, c_in)


def residual_block(x_nchw, w1, g1, b1, w2, g2, b2):
    """Forward pass of ResidualBlock. x_nchw: (N, C, H, W) float32."""
    n, c, h, w = x_nchw.shape
    l = h * w

    # Lane-dense compact layout (C on sublanes, H*W on lanes): a FREE reshape.
    # No wrapper-side jnp.pad / slice HBM passes; the conv halo lives only in
    # the kernel's VMEM scratch.
    xflat = x_nchw.reshape(n, c, l)

    # Samples per grid step (divisor of N, capped) to amortize per-step cost.
    bs = math.gcd(n, 8)

    # Halo rows: >= 2 (tap reach) and, when cheap, chosen so HALO*W % 128 == 0
    # -> the interior scratch stores are lane-aligned (unmasked, no rotates).
    step = 128 // math.gcd(w, 128)
    halo = step * ((2 + step - 1) // step)
    if halo > 16:            # awkward width: give up alignment, keep it small
        halo = 2
    pp = (h + 2 * halo) * w

    w1t, w2t = _taps(w1), _taps(w2)
    g1r, b1r = g1.reshape(c, 1), b1.reshape(c, 1)
    g2r, b2r = g2.reshape(c, 1), b2.reshape(c, 1)

    kernel = functools.partial(_res_block_kernel, H=h, W=w, C=c, B=bs, HALO=halo)
    rep2 = lambda i: (0, 0)            # grid-invariant operands
    rep3 = lambda i: (0, 0, 0)

    # Rough VMEM budget (double-buffered I/O blocks + scratch) with headroom.
    blk_bytes = bs * c * l * 4
    vmem_limit = int(min(max(8 * blk_bytes + c * pp * 4 + (4 << 20), 16 << 20),
                         64 << 20))

    out = pl.pallas_call(
        kernel,
        out_shape=jax.ShapeDtypeStruct((n, c, l), jnp.float32),
        grid_spec=pltpu.PrefetchScalarGridSpec(
            num_scalar_prefetch=0,
            grid=(n // bs,),
            in_specs=[
                pl.BlockSpec((bs, c, l), lambda i: (i, 0, 0)),   # x (compact)
                pl.BlockSpec((9, c, c), rep3),                   # w1 taps
                pl.BlockSpec((9, c, c), rep3),                   # w2 taps
                pl.BlockSpec((c, 1), rep2),                      # gamma1
                pl.BlockSpec((c, 1), rep2),                      # beta1
                pl.BlockSpec((c, 1), rep2),                      # gamma2
                pl.BlockSpec((c, 1), rep2),                      # beta2
            ],
            out_specs=pl.BlockSpec((bs, c, l), lambda i: (i, 0, 0)),
            scratch_shapes=[pltpu.VMEM((c, pp), jnp.float32)],
        ),
        compiler_params=pltpu.CompilerParams(
            dimension_semantics=("parallel",),
            vmem_limit_bytes=vmem_limit),
    )(xflat, w1t, w2t, g1r, b1r, g2r, b2r)

    # Free reshape back to NCHW.
    return out.reshape(n, c, h, w)


# ------------------------- setup / reference ---------------------------------

def spectral_normalize(w_oihw):
    """Divide conv weight by its top singular value (of the (Cout, -1) matrix)."""
    wm = np.asarray(w_oihw).reshape(w_oihw.shape[0], -1)
    sigma = np.linalg.svd(wm, compute_uv=False)[0]
    return (w_oihw / sigma).astype(jnp.float32)


def reference(x_nchw, w1, g1, b1, w2, g2, b2):
    """Pure-JAX reference (same semantics as the PyTorch module in train mode)."""
    def conv(x, w):
        return jax.lax.conv_general_dilated(
            x, w, (1, 1), ((1, 1), (1, 1)),
            dimension_numbers=("NCHW", "OIHW", "NCHW"))

    def inorm(y, g, b):
        mean = y.mean(axis=(2, 3), keepdims=True)
        var = ((y - mean) ** 2).mean(axis=(2, 3), keepdims=True)
        return (y - mean) / jnp.sqrt(var + EPS) * g[None, :, None, None] \
            + b[None, :, None, None]

    h = jnp.maximum(inorm(conv(x_nchw, w1), g1, b1), 0.0)
    h = inorm(conv(h, w2), g2, b2)
    return x_nchw + h


if __name__ == "__main__":
    N, C, H, W = 2, 8, 16, 16          # dim_in == dim_out (required by residual add)

    key = jax.random.PRNGKey(0)
    kx, kw1, kw2 = jax.random.split(key, 3)

    x = jax.random.normal(kx, (N, C, H, W), dtype=jnp.float32)

    # conv weights (Cout, Cin, 3, 3), spectrally normalized in setup glue
    w1 = spectral_normalize(jax.random.normal(kw1, (C, C, 3, 3), jnp.float32) * 0.2)
    w2 = spectral_normalize(jax.random.normal(kw2, (C, C, 3, 3), jnp.float32) * 0.2)

    # InstanceNorm2d affine params (PyTorch init: weight=1, bias=0)
    g1 = jnp.ones((C,), jnp.float32)
    b1 = jnp.zeros((C,), jnp.float32)
    g2 = jnp.ones((C,), jnp.float32)
    b2 = jnp.zeros((C,), jnp.float32)

    out = jax.block_until_ready(residual_block(x, w1, g1, b1, w2, g2, b2))
    ref = jax.block_until_ready(reference(x, w1, g1, b1, w2, g2, b2))
    np.testing.assert_allclose(np.asarray(out), np.asarray(ref),
                               rtol=2e-4, atol=2e-4)

    print("KERNEL_OK")
</pallas_src>

<mosaic_0001>
module attributes {stable_mosaic.version = 11 : i64} {
  func.func @_res_block_kernel(%arg0: i32, %arg1: memref<2x8x256xf32, #tpu.memory_space<vmem>>, %arg2: memref<9x8x8xf32, #tpu.memory_space<vmem>>, %arg3: memref<9x8x8xf32, #tpu.memory_space<vmem>>, %arg4: memref<8x1xf32, #tpu.memory_space<vmem>>, %arg5: memref<8x1xf32, #tpu.memory_space<vmem>>, %arg6: memref<8x1xf32, #tpu.memory_space<vmem>>, %arg7: memref<8x1xf32, #tpu.memory_space<vmem>>, %arg8: memref<2x8x256xf32, #tpu.memory_space<vmem>>, %arg9: memref<8x512xf32, #tpu.memory_space<vmem>>) attributes {dimension_semantics = [#tpu.dimension_semantics<parallel>], iteration_bounds = array<i64: 1>, scalar_prefetch = 0 : i64, scratch_operands = 1 : i64, tpu.core_type = #tpu.core_type<tc>, window_params = [{transform_indices = @transform_0, window_bounds = array<i64: 2, 8, 256>}, {pipeline_mode = #tpu.pipeline_mode<synchronous>, transform_indices = @transform_1, window_bounds = array<i64: 9, 8, 8>}, {pipeline_mode = #tpu.pipeline_mode<synchronous>, transform_indices = @transform_2, window_bounds = array<i64: 9, 8, 8>}, {pipeline_mode = #tpu.pipeline_mode<synchronous>, transform_indices = @transform_3, window_bounds = array<i64: 8, 1>}, {pipeline_mode = #tpu.pipeline_mode<synchronous>, transform_indices = @transform_4, window_bounds = array<i64: 8, 1>}, {pipeline_mode = #tpu.pipeline_mode<synchronous>, transform_indices = @transform_5, window_bounds = array<i64: 8, 1>}, {pipeline_mode = #tpu.pipeline_mode<synchronous>, transform_indices = @transform_6, window_bounds = array<i64: 8, 1>}, {transform_indices = @transform_7, window_bounds = array<i64: 2, 8, 256>}]} {
    %cst = arith.constant 0.000000e+00 : f32
    %0 = vector.broadcast %cst : f32 to vector<8x128xf32>
    %c0 = arith.constant 0 : index
    %c0_0 = arith.constant 0 : index
    %1 = vector.load %arg9[%c0, %c0_0] : memref<8x512xf32, #tpu.memory_space<vmem>>, vector<8x128xf32>
    tpu.vector_store %arg9[%c0, %c0_0], %0 {strides = array<i32>} : memref<8x512xf32, #tpu.memory_space<vmem>>, vector<8x128xf32>,
    %cst_1 = arith.constant 0.000000e+00 : f32
    %2 = vector.broadcast %cst_1 : f32 to vector<8x128xf32>
    %c0_2 = arith.constant 0 : index
    %c384 = arith.constant 384 : index
    %3 = vector.load %arg9[%c0_2, %c384] : memref<8x512xf32, #tpu.memory_space<vmem>>, vector<8x128xf32>
    tpu.vector_store %arg9[%c0_2, %c384], %2 {strides = array<i32>} : memref<8x512xf32, #tpu.memory_space<vmem>>, vector<8x128xf32>,
    %4 = tpu.iota {dimensions = array<i32: 1>} : vector<1x256xi32>
    %c16_i32 = arith.constant 16 : i32
    %c0_i32 = arith.constant 0 : i32
    %5 = arith.cmpi eq, %c16_i32, %c0_i32 : i32
    %c1_i32 = arith.constant 1 : i32
    %6 = arith.select %5, %c1_i32, %c16_i32 : i32
    %7 = vector.broadcast %6 : i32 to vector<1x256xi32>
    %8 = arith.remsi %4, %7 : vector<1x256xi32>
    %c0_i32_3 = arith.constant 0 : i32
    %9 = vector.broadcast %c0_i32_3 : i32 to vector<1x256xi32>
    %10 = arith.cmpi ne, %8, %9 : vector<1x256xi32>
    %c0_i32_4 = arith.constant 0 : i32
    %11 = vector.broadcast %c0_i32_4 : i32 to vector<1x256xi32>
    %12 = arith.cmpi slt, %8, %11 : vector<1x256xi32>
    %c0_i32_5 = arith.constant 0 : i32
    %13 = arith.cmpi slt, %6, %c0_i32_5 : i32
    %14 = vector.broadcast %13 : i1 to vector<1x256xi1>
    %15 = vector.broadcast %14 : vector<1x256xi1> to vector<1x256xi1>
    %16 = arith.xori %12, %15 : vector<1x256xi1>
    %17 = arith.andi %16, %10 : vector<1x256xi1>
    %18 = vector.broadcast %6 : i32 to vector<1x256xi32>
    %19 = arith.addi %8, %18 : vector<1x256xi32>
    %20 = arith.select %17, %19, %8 : vector<1x256xi1>, vector<1x256xi32>
    %c0_i32_6 = arith.constant 0 : i32
    %21 = vector.broadcast %c0_i32_6 : i32 to vector<1x256xi32>
    %22 = arith.cmpi ne, %20, %21 : vector<1x256xi32>
    %23 = arith.extui %22 : vector<1x256xi1> to vector<1x256xi32>
    %24 = arith.sitofp %23 : vector<1x256xi32> to vector<1x256xf32>
    %c15_i32 = arith.constant 15 : i32
    %25 = vector.broadcast %c15_i32 : i32 to vector<1x256xi32>
    %26 = arith.cmpi ne, %20, %25 : vector<1x256xi32>
    %27 = arith.extui %26 : vector<1x256xi1> to vector<1x256xi32>
    %28 = arith.sitofp %27 : vector<1x256xi32> to vector<1x256xf32>
    %c0_7 = arith.constant 0 : index
    %c0_8 = arith.constant 0 : index
    %c0_9 = arith.constant 0 : index
    %29 = vector.load %arg2[%c0_7, %c0_8, %c0_9] : memref<9x8x8xf32, #tpu.memory_space<vmem>>, vector<1x8x8xf32>
    %30 = vector.shape_cast %29 : vector<1x8x8xf32> to vector<8x8xf32>
    %c1 = arith.constant 1 : index
    %c0_10 = arith.constant 0 : index
    %c0_11 = arith.constant 0 : index
    %31 = vector.load %arg2[%c1, %c0_10, %c0_11] : memref<9x8x8xf32, #tpu.memory_space<vmem>>, vector<1x8x8xf32>
    %32 = vector.shape_cast %31 : vector<1x8x8xf32> to vector<8x8xf32>
    %c2 = arith.constant 2 : index
    %c0_12 = arith.constant 0 : index
    %c0_13 = arith.constant 0 : index
    %33 = vector.load %arg2[%c2, %c0_12, %c0_13] : memref<9x8x8xf32, #tpu.memory_space<vmem>>, vector<1x8x8xf32>
    %34 = vector.shape_cast %33 : vector<1x8x8xf32> to vector<8x8xf32>
    %c3 = arith.constant 3 : index
    %c0_14 = arith.constant 0 : index
    %c0_15 = arith.constant 0 : index
    %35 = vector.load %arg2[%c3, %c0_14, %c0_15] : memref<9x8x8xf32, #tpu.memory_space<vmem>>, vector<1x8x8xf32>
    %36 = vector.shape_cast %35 : vector<1x8x8xf32> to vector<8x8xf32>
    %c4 = arith.constant 4 : index
    %c0_16 = arith.constant 0 : index
    %c0_17 = arith.constant 0 : index
    %37 = vector.load %arg2[%c4, %c0_16, %c0_17] : memref<9x8x8xf32, #tpu.memory_space<vmem>>, vector<1x8x8xf32>
    %38 = vector.shape_cast %37 : vector<1x8x8xf32> to vector<8x8xf32>
    %c5 = arith.constant 5 : index
    %c0_18 = arith.constant 0 : index
    %c0_19 = arith.constant 0 : index
    %39 = vector.load %arg2[%c5, %c0_18, %c0_19] : memref<9x8x8xf32, #tpu.memory_space<vmem>>, vector<1x8x8xf32>
    %40 = vector.shape_cast %39 : vector<1x8x8xf32> to vector<8x8xf32>
    %c6 = arith.constant 6 : index
    %c0_20 = arith.constant 0 : index
    %c0_21 = arith.constant 0 : index
    %41 = vector.load %arg2[%c6, %c0_20, %c0_21] : memref<9x8x8xf32, #tpu.memory_space<vmem>>, vector<1x8x8xf32>
    %42 = vector.shape_cast %41 : vector<1x8x8xf32> to vector<8x8xf32>
    %c7 = arith.constant 7 : index
    %c0_22 = arith.constant 0 : index
    %c0_23 = arith.constant 0 : index
    %43 = vector.load %arg2[%c7, %c0_22, %c0_23] : memref<9x8x8xf32, #tpu.memory_space<vmem>>, vector<1x8x8xf32>
    %44 = vector.shape_cast %43 : vector<1x8x8xf32> to vector<8x8xf32>
    %c8 = arith.constant 8 : index
    %c0_24 = arith.constant 0 : index
    %c0_25 = arith.constant 0 : index
    %45 = vector.load %arg2[%c8, %c0_24, %c0_25] : memref<9x8x8xf32, #tpu.memory_space<vmem>>, vector<1x8x8xf32>
    %46 = vector.shape_cast %45 : vector<1x8x8xf32> to vector<8x8xf32>
    %c0_26 = arith.constant 0 : index
    %c0_27 = arith.constant 0 : index
    %c0_28 = arith.constant 0 : index
    %47 = vector.load %arg3[%c0_26, %c0_27, %c0_28] : memref<9x8x8xf32, #tpu.memory_space<vmem>>, vector<1x8x8xf32>
    %48 = vector.shape_cast %47 : vector<1x8x8xf32> to vector<8x8xf32>
    %c1_29 = arith.constant 1 : index
    %c0_30 = arith.constant 0 : index
    %c0_31 = arith.constant 0 : index
    %49 = vector.load %arg3[%c1_29, %c0_30, %c0_31] : memref<9x8x8xf32, #tpu.memory_space<vmem>>, vector<1x8x8xf32>
    %50 = vector.shape_cast %49 : vector<1x8x8xf32> to vector<8x8xf32>
    %c2_32 = arith.constant 2 : index
    %c0_33 = arith.constant 0 : index
    %c0_34 = arith.constant 0 : index
    %51 = vector.load %arg3[%c2_32, %c0_33, %c0_34] : memref<9x8x8xf32, #tpu.memory_space<vmem>>, vector<1x8x8xf32>
    %52 = vector.shape_cast %51 : vector<1x8x8xf32> to vector<8x8xf32>
    %c3_35 = arith.constant 3 : index
    %c0_36 = arith.constant 0 : index
    %c0_37 = arith.constant 0 : index
    %53 = vector.load %arg3[%c3_35, %c0_36, %c0_37] : memref<9x8x8xf32, #tpu.memory_space<vmem>>, vector<1x8x8xf32>
    %54 = vector.shape_cast %53 : vector<1x8x8xf32> to vector<8x8xf32>
    %c4_38 = arith.constant 4 : index
    %c0_39 = arith.constant 0 : index
    %c0_40 = arith.constant 0 : index
    %55 = vector.load %arg3[%c4_38, %c0_39, %c0_40] : memref<9x8x8xf32, #tpu.memory_space<vmem>>, vector<1x8x8xf32>
    %56 = vector.shape_cast %55 : vector<1x8x8xf32> to vector<8x8xf32>
    %c5_41 = arith.constant 5 : index
    %c0_42 = arith.constant 0 : index
    %c0_43 = arith.constant 0 : index
    %57 = vector.load %arg3[%c5_41, %c0_42, %c0_43] : memref<9x8x8xf32, #tpu.memory_space<vmem>>, vector<1x8x8xf32>
    %58 = vector.shape_cast %57 : vector<1x8x8xf32> to vector<8x8xf32>
    %c6_44 = arith.constant 6 : index
    %c0_45 = arith.constant 0 : index
    %c0_46 = arith.constant 0 : index
    %59 = vector.load %arg3[%c6_44, %c0_45, %c0_46] : memref<9x8x8xf32, #tpu.memory_space<vmem>>, vector<1x8x8xf32>
    %60 = vector.shape_cast %59 : vector<1x8x8xf32> to vector<8x8xf32>
    %c7_47 = arith.constant 7 : index
    %c0_48 = arith.constant 0 : index
    %c0_49 = arith.constant 0 : index
    %61 = vector.load %arg3[%c7_47, %c0_48, %c0_49] : memref<9x8x8xf32, #tpu.memory_space<vmem>>, vector<1x8x8xf32>
    %62 = vector.shape_cast %61 : vector<1x8x8xf32> to vector<8x8xf32>
    %c8_50 = arith.constant 8 : index
    %c0_51 = arith.constant 0 : index
    %c0_52 = arith.constant 0 : index
    %63 = vector.load %arg3[%c8_50, %c0_51, %c0_52] : memref<9x8x8xf32, #tpu.memory_space<vmem>>, vector<1x8x8xf32>
    %64 = vector.shape_cast %63 : vector<1x8x8xf32> to vector<8x8xf32>
    %c0_53 = arith.constant 0 : index
    %c0_54 = arith.constant 0 : index
    %65 = vector.load %arg4[%c0_53, %c0_54] : memref<8x1xf32, #tpu.memory_space<vmem>>, vector<8x1xf32>
    %c0_55 = arith.constant 0 : index
    %c0_56 = arith.constant 0 : index
    %66 = vector.load %arg5[%c0_55, %c0_56] : memref<8x1xf32, #tpu.memory_space<vmem>>, vector<8x1xf32>
    %c0_57 = arith.constant 0 : index
    %c0_58 = arith.constant 0 : index
    %67 = vector.load %arg6[%c0_57, %c0_58] : memref<8x1xf32, #tpu.memory_space<vmem>>, vector<8x1xf32>
    %c0_59 = arith.constant 0 : index
    %c0_60 = arith.constant 0 : index
    %68 = vector.load %arg7[%c0_59, %c0_60] : memref<8x1xf32, #tpu.memory_space<vmem>>, vector<8x1xf32>
    %c0_61 = arith.constant 0 : index
    %c0_62 = arith.constant 0 : index
    %c0_63 = arith.constant 0 : index
    %69 = vector.load %arg1[%c0_61, %c0_62, %c0_63] : memref<2x8x256xf32, #tpu.memory_space<vmem>>, vector<1x8x256xf32>
    %70 = vector.shape_cast %69 : vector<1x8x256xf32> to vector<8x256xf32>
    %c0_64 = arith.constant 0 : index
    %c128 = arith.constant 128 : index
    %71 = vector.load %arg9[%c0_64, %c128] : memref<8x512xf32, #tpu.memory_space<vmem>>, vector<8x256xf32>
    tpu.vector_store %arg9[%c0_64, %c128], %70 {strides = array<i32>} : memref<8x512xf32, #tpu.memory_space<vmem>>, vector<8x256xf32>,
    %c0_65 = arith.constant 0 : index
    %c111 = arith.constant 111 : index
    %72 = vector.load %arg9[%c0_65, %c111] : memref<8x512xf32, #tpu.memory_space<vmem>>, vector<8x256xf32>
    %73 = vector.broadcast %24 : vector<1x256xf32> to vector<8x256xf32>
    %74 = arith.mulf %72, %73 : vector<8x256xf32>
    %cst_66 = arith.constant dense<0.000000e+00> : vector<8x256xf32>
    %75 = tpu.matmul %30, %74, %cst_66 {dimension_numbers = #tpu.dot_dimension_numbers<[1], [0], [0], [1], [0, 0, 1, 1], [], []>} : vector<8x8xf32>, vector<8x256xf32>, vector<8x256xf32> -> vector<8x256xf32>
    %c0_67 = arith.constant 0 : index
    %c112 = arith.constant 112 : index
    %76 = vector.load %arg9[%c0_67, %c112] : memref<8x512xf32, #tpu.memory_space<vmem>>, vector<8x256xf32>
    %cst_68 = arith.constant dense<0.000000e+00> : vector<8x256xf32>
    %77 = tpu.matmul %32, %76, %cst_68 {dimension_numbers = #tpu.dot_dimension_numbers<[1], [0], [0], [1], [0, 0, 1, 1], [], []>} : vector<8x8xf32>, vector<8x256xf32>, vector<8x256xf32> -> vector<8x256xf32>
    %78 = arith.addf %75, %77 : vector<8x256xf32>
    %c0_69 = arith.constant 0 : index
    %c113 = arith.constant 113 : index
    %79 = vector.load %arg9[%c0_69, %c113] : memref<8x512xf32, #tpu.memory_space<vmem>>, vector<8x256xf32>
    %80 = vector.broadcast %28 : vector<1x256xf32> to vector<8x256xf32>
    %81 = arith.mulf %79, %80 : vector<8x256xf32>
    %cst_70 = arith.constant dense<0.000000e+00> : vector<8x256xf32>
    %82 = tpu.matmul %34, %81, %cst_70 {dimension_numbers = #tpu.dot_dimension_numbers<[1], [0], [0], [1], [0, 0, 1, 1], [], []>} : vector<8x8xf32>, vector<8x256xf32>, vector<8x256xf32> -> vector<8x256xf32>
    %83 = arith.addf %78, %82 : vector<8x256xf32>
    %c0_71 = arith.constant 0 : index
    %c127 = arith.constant 127 : index
    %84 = vector.load %arg9[%c0_71, %c127] : memref<8x512xf32, #tpu.memory_space<vmem>>, vector<8x256xf32>
    %85 = vector.broadcast %24 : vector<1x256xf32> to vector<8x256xf32>
    %86 = arith.mulf %84, %85 : vector<8x256xf32>
    %cst_72 = arith.constant dense<0.000000e+00> : vector<8x256xf32>
    %87 = tpu.matmul %36, %86, %cst_72 {dimension_numbers = #tpu.dot_dimension_numbers<[1], [0], [0], [1], [0, 0, 1, 1], [], []>} : vector<8x8xf32>, vector<8x256xf32>, vector<8x256xf32> -> vector<8x256xf32>
    %88 = arith.addf %83, %87 : vector<8x256xf32>
    %c0_73 = arith.constant 0 : index
    %c128_74 = arith.constant 128 : index
    %89 = vector.load %arg9[%c0_73, %c128_74] : memref<8x512xf32, #tpu.memory_space<vmem>>, vector<8x256xf32>
    %cst_75 = arith.constant dense<0.000000e+00> : vector<8x256xf32>
    %90 = tpu.matmul %38, %89, %cst_75 {dimension_numbers = #tpu.dot_dimension_numbers<[1], [0], [0], [1], [0, 0, 1, 1], [], []>} : vector<8x8xf32>, vector<8x256xf32>, vector<8x256xf32> -> vector<8x256xf32>
    %91 = arith.addf %88, %90 : vector<8x256xf32>
    %c0_76 = arith.constant 0 : index
    %c129 = arith.constant 129 : index
    %92 = vector.load %arg9[%c0_76, %c129] : memref<8x512xf32, #tpu.memory_space<vmem>>, vector<8x256xf32>
    %93 = vector.broadcast %28 : vector<1x256xf32> to vector<8x256xf32>
    %94 = arith.mulf %92, %93 : vector<8x256xf32>
    %cst_77 = arith.constant dense<0.000000e+00> : vector<8x256xf32>
    %95 = tpu.matmul %40, %94, %cst_77 {dimension_numbers = #tpu.dot_dimension_numbers<[1], [0], [0], [1], [0, 0, 1, 1], [], []>} : vector<8x8xf32>, vector<8x256xf32>, vector<8x256xf32> -> vector<8x256xf32>
    %96 = arith.addf %91, %95 : vector<8x256xf32>
    %c0_78 = arith.constant 0 : index
    %c143 = arith.constant 143 : index
    %97 = vector.load %arg9[%c0_78, %c143] : memref<8x512xf32, #tpu.memory_space<vmem>>, vector<8x256xf32>
    %98 = vector.broadcast %24 : vector<1x256xf32> to vector<8x256xf32>
    %99 = arith.mulf %97, %98 : vector<8x256xf32>
    %cst_79 = arith.constant dense<0.000000e+00> : vector<8x256xf32>
    %100 = tpu.matmul %42, %99, %cst_79 {dimension_numbers = #tpu.dot_dimension_numbers<[1], [0], [0], [1], [0, 0, 1, 1], [], []>} : vector<8x8xf32>, vector<8x256xf32>, vector<8x256xf32> -> vector<8x256xf32>
    %101 = arith.addf %96, %100 : vector<8x256xf32>
    %c0_80 = arith.constant 0 : index
    %c144 = arith.constant 144 : index
    %102 = vector.load %arg9[%c0_80, %c144] : memref<8x512xf32, #tpu.memory_space<vmem>>, vector<8x256xf32>
    %cst_81 = arith.constant dense<0.000000e+00> : vector<8x256xf32>
    %103 = tpu.matmul %44, %102, %cst_81 {dimension_numbers = #tpu.dot_dimension_numbers<[1], [0], [0], [1], [0, 0, 1, 1], [], []>} : vector<8x8xf32>, vector<8x256xf32>, vector<8x256xf32> -> vector<8x256xf32>
    %104 = arith.addf %101, %103 : vector<8x256xf32>
    %c0_82 = arith.constant 0 : index
    %c145 = arith.constant 145 : index
    %105 = vector.load %arg9[%c0_82, %c145] : memref<8x512xf32, #tpu.memory_space<vmem>>, vector<8x256xf32>
    %106 = vector.broadcast %28 : vector<1x256xf32> to vector<8x256xf32>
    %107 = arith.mulf %105, %106 : vector<8x256xf32>
    %cst_83 = arith.constant dense<0.000000e+00> : vector<8x256xf32>
    %108 = tpu.matmul %46, %107, %cst_83 {dimension_numbers = #tpu.dot_dimension_numbers<[1], [0], [0], [1], [0, 0, 1, 1], [], []>} : vector<8x8xf32>, vector<8x256xf32>, vector<8x256xf32> -> vector<8x256xf32>
    %109 = arith.addf %104, %108 : vector<8x256xf32>
    %cst_84 = arith.constant dense<0.000000e+00> : vector<8xf32>
    %110 = vector.multi_reduction <add>, %109, %cst_84 [1] : vector<8x256xf32> to vector<8xf32>
    %111 = vector.shape_cast %110 : vector<8xf32> to vector<8x1xf32>
    %112 = arith.mulf %109, %109 : vector<8x256xf32>
    %cst_85 = arith.constant dense<0.000000e+00> : vector<8xf32>
    %113 = vector.multi_reduction <add>, %112, %cst_85 [1] : vector<8x256xf32> to vector<8xf32>
    %114 = vector.shape_cast %113 : vector<8xf32> to vector<8x1xf32>
    %cst_86 = arith.constant 3.906250e-03 : f32
    %115 = vector.broadcast %cst_86 : f32 to vector<8x1xf32>
    %116 = arith.mulf %111, %115 : vector<8x1xf32>
    %cst_87 = arith.constant 3.906250e-03 : f32
    %117 = vector.broadcast %cst_87 : f32 to vector<8x1xf32>
    %118 = arith.mulf %114, %117 : vector<8x1xf32>
    %119 = arith.mulf %116, %116 : vector<8x1xf32>
    %120 = arith.subf %118, %119 : vector<8x1xf32>
    %cst_88 = arith.constant 9.99999974E-6 : f32
    %121 = vector.broadcast %cst_88 : f32 to vector<8x1xf32>
    %122 = arith.addf %120, %121 : vector<8x1xf32>
    %123 = math.rsqrt %122 : vector<8x1xf32>
    %124 = arith.mulf %65, %123 : vector<8x1xf32>
    %125 = arith.mulf %116, %124 : vector<8x1xf32>
    %126 = arith.subf %66, %125 : vector<8x1xf32>
    %127 = vector.broadcast %124 : vector<8x1xf32> to vector<8x256xf32>
    %128 = arith.mulf %109, %127 : vector<8x256xf32>
    %129 = vector.broadcast %126 : vector<8x1xf32> to vector<8x256xf32>
    %130 = arith.addf %128, %129 : vector<8x256xf32>
    %cst_89 = arith.constant 0.000000e+00 : f32
    %131 = vector.broadcast %cst_89 : f32 to vector<8x256xf32>
    %132 = arith.maximumf %130, %131 : vector<8x256xf32>
    %c0_90 = arith.constant 0 : index
    %c128_91 = arith.constant 128 : index
    %133 = vector.load %arg9[%c0_90, %c128_91] : memref<8x512xf32, #tpu.memory_space<vmem>>, vector<8x256xf32>
    tpu.vector_store %arg9[%c0_90, %c128_91], %132 {strides = array<i32>} : memref<8x512xf32, #tpu.memory_space<vmem>>, vector<8x256xf32>,
    %c0_92 = arith.constant 0 : index
    %c111_93 = arith.constant 111 : index
    %134 = vector.load %arg9[%c0_92, %c111_93] : memref<8x512xf32, #tpu.memory_space<vmem>>, vector<8x256xf32>
    %135 = vector.broadcast %24 : vector<1x256xf32> to vector<8x256xf32>
    %136 = arith.mulf %134, %135 : vector<8x256xf32>
    %cst_94 = arith.constant dense<0.000000e+00> : vector<8x256xf32>
    %137 = tpu.matmul %48, %136, %cst_94 {dimension_numbers = #tpu.dot_dimension_numbers<[1], [0], [0], [1], [0, 0, 1, 1], [], []>} : vector<8x8xf32>, vector<8x256xf32>, vector<8x256xf32> -> vector<8x256xf32>
    %c0_95 = arith.constant 0 : index
    %c112_96 = arith.constant 112 : index
    %138 = vector.load %arg9[%c0_95, %c112_96] : memref<8x512xf32, #tpu.memory_space<vmem>>, vector<8x256xf32>
    %cst_97 = arith.constant dense<0.000000e+00> : vector<8x256xf32>
    %139 = tpu.matmul %50, %138, %cst_97 {dimension_numbers = #tpu.dot_dimension_numbers<[1], [0], [0], [1], [0, 0, 1, 1], [], []>} : vector<8x8xf32>, vector<8x256xf32>, vector<8x256xf32> -> vector<8x256xf32>
    %140 = arith.addf %137, %139 : vector<8x256xf32>
    %c0_98 = arith.constant 0 : index
    %c113_99 = arith.constant 113 : index
    %141 = vector.load %arg9[%c0_98, %c113_99] : memref<8x512xf32, #tpu.memory_space<vmem>>, vector<8x256xf32>
    %142 = vector.broadcast %28 : vector<1x256xf32> to vector<8x256xf32>
    %143 = arith.mulf %141, %142 : vector<8x256xf32>
    %cst_100 = arith.constant dense<0.000000e+00> : vector<8x256xf32>
    %144 = tpu.matmul %52, %143, %cst_100 {dimension_numbers = #tpu.dot_dimension_numbers<[1], [0], [0], [1], [0, 0, 1, 1], [], []>} : vector<8x8xf32>, vector<8x256xf32>, vector<8x256xf32> -> vector<8x256xf32>
    %145 = arith.addf %140, %144 : vector<8x256xf32>
    %c0_101 = arith.constant 0 : index
    %c127_102 = arith.constant 127 : index
    %146 = vector.load %arg9[%c0_101, %c127_102] : memref<8x512xf32, #tpu.memory_space<vmem>>, vector<8x256xf32>
    %147 = vector.broadcast %24 : vector<1x256xf32> to vector<8x256xf32>
    %148 = arith.mulf %146, %147 : vector<8x256xf32>
    %cst_103 = arith.constant dense<0.000000e+00> : vector<8x256xf32>
    %149 = tpu.matmul %54, %148, %cst_103 {dimension_numbers = #tpu.dot_dimension_numbers<[1], [0], [0], [1], [0, 0, 1, 1], [], []>} : vector<8x8xf32>, vector<8x256xf32>, vector<8x256xf32> -> vector<8x256xf32>
    %150 = arith.addf %145, %149 : vector<8x256xf32>
    %c0_104 = arith.constant 0 : index
    %c128_105 = arith.constant 128 : index
    %151 = vector.load %arg9[%c0_104, %c128_105] : memref<8x512xf32, #tpu.memory_space<vmem>>, vector<8x256xf32>
    %cst_106 = arith.constant dense<0.000000e+00> : vector<8x256xf32>
    %152 = tpu.matmul %56, %151, %cst_106 {dimension_numbers = #tpu.dot_dimension_numbers<[1], [0], [0], [1], [0, 0, 1, 1], [], []>} : vector<8x8xf32>, vector<8x256xf32>, vector<8x256xf32> -> vector<8x256xf32>
    %153 = arith.addf %150, %152 : vector<8x256xf32>
    %c0_107 = arith.constant 0 : index
    %c129_108 = arith.constant 129 : index
    %154 = vector.load %arg9[%c0_107, %c129_108] : memref<8x512xf32, #tpu.memory_space<vmem>>, vector<8x256xf32>
    %155 = vector.broadcast %28 : vector<1x256xf32> to vector<8x256xf32>
    %156 = arith.mulf %154, %155 : vector<8x256xf32>
    %cst_109 = arith.constant dense<0.000000e+00> : vector<8x256xf32>
    %157 = tpu.matmul %58, %156, %cst_109 {dimension_numbers = #tpu.dot_dimension_numbers<[1], [0], [0], [1], [0, 0, 1, 1], [], []>} : vector<8x8xf32>, vector<8x256xf32>, vector<8x256xf32> -> vector<8x256xf32>
    %158 = arith.addf %153, %157 : vector<8x256xf32>
    %c0_110 = arith.constant 0 : index
    %c143_111 = arith.constant 143 : index
    %159 = vector.load %arg9[%c0_110, %c143_111] : memref<8x512xf32, #tpu.memory_space<vmem>>, vector<8x256xf32>
    %160 = vector.broadcast %24 : vector<1x256xf32> to vector<8x256xf32>
    %161 = arith.mulf %159, %160 : vector<8x256xf32>
    %cst_112 = arith.constant dense<0.000000e+00> : vector<8x256xf32>
    %162 = tpu.matmul %60, %161, %cst_112 {dimension_numbers = #tpu.dot_dimension_numbers<[1], [0], [0], [1], [0, 0, 1, 1], [], []>} : vector<8x8xf32>, vector<8x256xf32>, vector<8x256xf32> -> vector<8x256xf32>
    %163 = arith.addf %158, %162 : vector<8x256xf32>
    %c0_113 = arith.constant 0 : index
    %c144_114 = arith.constant 144 : index
    %164 = vector.load %arg9[%c0_113, %c144_114] : memref<8x512xf32, #tpu.memory_space<vmem>>, vector<8x256xf32>
    %cst_115 = arith.constant dense<0.000000e+00> : vector<8x256xf32>
    %165 = tpu.matmul %62, %164, %cst_115 {dimension_numbers = #tpu.dot_dimension_numbers<[1], [0], [0], [1], [0, 0, 1, 1], [], []>} : vector<8x8xf32>, vector<8x256xf32>, vector<8x256xf32> -> vector<8x256xf32>
    %166 = arith.addf %163, %165 : vector<8x256xf32>
    %c0_116 = arith.constant 0 : index
    %c145_117 = arith.constant 145 : index
    %167 = vector.load %arg9[%c0_116, %c145_117] : memref<8x512xf32, #tpu.memory_space<vmem>>, vector<8x256xf32>
    %168 = vector.broadcast %28 : vector<1x256xf32> to vector<8x256xf32>
    %169 = arith.mulf %167, %168 : vector<8x256xf32>
    %cst_118 = arith.constant dense<0.000000e+00> : vector<8x256xf32>
    %170 = tpu.matmul %64, %169, %cst_118 {dimension_numbers = #tpu.dot_dimension_numbers<[1], [0], [0], [1], [0, 0, 1, 1], [], []>} : vector<8x8xf32>, vector<8x256xf32>, vector<8x256xf32> -> vector<8x256xf32>
    %171 = arith.addf %166, %170 : vector<8x256xf32>
    %cst_119 = arith.constant dense<0.000000e+00> : vector<8xf32>
    %172 = vector.multi_reduction <add>, %171, %cst_119 [1] : vector<8x256xf32> to vector<8xf32>
    %173 = vector.shape_cast %172 : vector<8xf32> to vector<8x1xf32>
    %174 = arith.mulf %171, %171 : vector<8x256xf32>
    %cst_120 = arith.constant dense<0.000000e+00> : vector<8xf32>
    %175 = vector.multi_reduction <add>, %174, %cst_120 [1] : vector<8x256xf32> to vector<8xf32>
    %176 = vector.shape_cast %175 : vector<8xf32> to vector<8x1xf32>
    %cst_121 = arith.constant 3.906250e-03 : f32
    %177 = vector.broadcast %cst_121 : f32 to vector<8x1xf32>
    %178 = arith.mulf %173, %177 : vector<8x1xf32>
    %cst_122 = arith.constant 3.906250e-03 : f32
    %179 = vector.broadcast %cst_122 : f32 to vector<8x1xf32>
    %180 = arith.mulf %176, %179 : vector<8x1xf32>
    %181 = arith.mulf %178, %178 : vector<8x1xf32>
    %182 = arith.subf %180, %181 : vector<8x1xf32>
    %cst_123 = arith.constant 9.99999974E-6 : f32
    %183 = vector.broadcast %cst_123 : f32 to vector<8x1xf32>
    %184 = arith.addf %182, %183 : vector<8x1xf32>
    %185 = math.rsqrt %184 : vector<8x1xf32>
    %186 = arith.mulf %67, %185 : vector<8x1xf32>
    %187 = arith.mulf %178, %186 : vector<8x1xf32>
    %188 = arith.subf %68, %187 : vector<8x1xf32>
    %189 = vector.broadcast %186 : vector<8x1xf32> to vector<8x256xf32>
    %190 = arith.mulf %171, %189 : vector<8x256xf32>
    %191 = vector.broadcast %188 : vector<8x1xf32> to vector<8x256xf32>
    %192 = arith.addf %190, %191 : vector<8x256xf32>
    %193 = arith.addf %70, %192 : vector<8x256xf32>
    %c0_124 = arith.constant 0 : index
    %c0_125 = arith.constant 0 : index
    %c0_126 = arith.constant 0 : index
    %194 = vector.load %arg8[%c0_124, %c0_125, %c0_126] : memref<2x8x256xf32, #tpu.memory_space<vmem>>, vector<1x8x256xf32>
    %195 = vector.shape_cast %194 : vector<1x8x256xf32> to vector<8x256xf32>
    %196 = vector.shape_cast %193 : vector<8x256xf32> to vector<1x8x256xf32>
    tpu.vector_store %arg8[%c0_124, %c0_125, %c0_126], %196 {strides = array<i32>} : memref<2x8x256xf32, #tpu.memory_space<vmem>>, vector<1x8x256xf32>,
    %c1_127 = arith.constant 1 : index
    %c0_128 = arith.constant 0 : index
    %c0_129 = arith.constant 0 : index
    %197 = vector.load %arg1[%c1_127, %c0_128, %c0_129] : memref<2x8x256xf32, #tpu.memory_space<vmem>>, vector<1x8x256xf32>
    %198 = vector.shape_cast %197 : vector<1x8x256xf32> to vector<8x256xf32>
    %c0_130 = arith.constant 0 : index
    %c128_131 = arith.constant 128 : index
    %199 = vector.load %arg9[%c0_130, %c128_131] : memref<8x512xf32, #tpu.memory_space<vmem>>, vector<8x256xf32>
    tpu.vector_store %arg9[%c0_130, %c128_131], %198 {strides = array<i32>} : memref<8x512xf32, #tpu.memory_space<vmem>>, vector<8x256xf32>,
    %c0_132 = arith.constant 0 : index
    %c111_133 = arith.constant 111 : index
    %200 = vector.load %arg9[%c0_132, %c111_133] : memref<8x512xf32, #tpu.memory_space<vmem>>, vector<8x256xf32>
    %201 = vector.broadcast %24 : vector<1x256xf32> to vector<8x256xf32>
    %202 = arith.mulf %200, %201 : vector<8x256xf32>
    %cst_134 = arith.constant dense<0.000000e+00> : vector<8x256xf32>
    %203 = tpu.matmul %30, %202, %cst_134 {dimension_numbers = #tpu.dot_dimension_numbers<[1], [0], [0], [1], [0, 0, 1, 1], [], []>} : vector<8x8xf32>, vector<8x256xf32>, vector<8x256xf32> -> vector<8x256xf32>
    %c0_135 = arith.constant 0 : index
    %c112_136 = arith.constant 112 : index
    %204 = vector.load %arg9[%c0_135, %c112_136] : memref<8x512xf32, #tpu.memory_space<vmem>>, vector<8x256xf32>
    %cst_137 = arith.constant dense<0.000000e+00> : vector<8x256xf32>
    %205 = tpu.matmul %32, %204, %cst_137 {dimension_numbers = #tpu.dot_dimension_numbers<[1], [0], [0], [1], [0, 0, 1, 1], [], []>} : vector<8x8xf32>, vector<8x256xf32>, vector<8x256xf32> -> vector<8x256xf32>
    %206 = arith.addf %203, %205 : vector<8x256xf32>
    %c0_138 = arith.constant 0 : index
    %c113_139 = arith.constant 113 : index
    %207 = vector.load %arg9[%c0_138, %c113_139] : memref<8x512xf32, #tpu.memory_space<vmem>>, vector<8x256xf32>
    %208 = vector.broadcast %28 : vector<1x256xf32> to vector<8x256xf32>
    %209 = arith.mulf %207, %208 : vector<8x256xf32>
    %cst_140 = arith.constant dense<0.000000e+00> : vector<8x256xf32>
    %210 = tpu.matmul %34, %209, %cst_140 {dimension_numbers = #tpu.dot_dimension_numbers<[1], [0], [0], [1], [0, 0, 1, 1], [], []>} : vector<8x8xf32>, vector<8x256xf32>, vector<8x256xf32> -> vector<8x256xf32>
    %211 = arith.addf %206, %210 : vector<8x256xf32>
    %c0_141 = arith.constant 0 : index
    %c127_142 = arith.constant 127 : index
    %212 = vector.load %arg9[%c0_141, %c127_142] : memref<8x512xf32, #tpu.memory_space<vmem>>, vector<8x256xf32>
    %213 = vector.broadcast %24 : vector<1x256xf32> to vector<8x256xf32>
    %214 = arith.mulf %212, %213 : vector<8x256xf32>
    %cst_143 = arith.constant dense<0.000000e+00> : vector<8x256xf32>
    %215 = tpu.matmul %36, %214, %cst_143 {dimension_numbers = #tpu.dot_dimension_numbers<[1], [0], [0], [1], [0, 0, 1, 1], [], []>} : vector<8x8xf32>, vector<8x256xf32>, vector<8x256xf32> -> vector<8x256xf32>
    %216 = arith.addf %211, %215 : vector<8x256xf32>
    %c0_144 = arith.constant 0 : index
    %c128_145 = arith.constant 128 : index
    %217 = vector.load %arg9[%c0_144, %c128_145] : memref<8x512xf32, #tpu.memory_space<vmem>>, vector<8x256xf32>
    %cst_146 = arith.constant dense<0.000000e+00> : vector<8x256xf32>
    %218 = tpu.matmul %38, %217, %cst_146 {dimension_numbers = #tpu.dot_dimension_numbers<[1], [0], [0], [1], [0, 0, 1, 1], [], []>} : vector<8x8xf32>, vector<8x256xf32>, vector<8x256xf32> -> vector<8x256xf32>
    %219 = arith.addf %216, %218 : vector<8x256xf32>
    %c0_147 = arith.constant 0 : index
    %c129_148 = arith.constant 129 : index
    %220 = vector.load %arg9[%c0_147, %c129_148] : memref<8x512xf32, #tpu.memory_space<vmem>>, vector<8x256xf32>
    %221 = vector.broadcast %28 : vector<1x256xf32> to vector<8x256xf32>
    %222 = arith.mulf %220, %221 : vector<8x256xf32>
    %cst_149 = arith.constant dense<0.000000e+00> : vector<8x256xf32>
    %223 = tpu.matmul %40, %222, %cst_149 {dimension_numbers = #tpu.dot_dimension_numbers<[1], [0], [0], [1], [0, 0, 1, 1], [], []>} : vector<8x8xf32>, vector<8x256xf32>, vector<8x256xf32> -> vector<8x256xf32>
    %224 = arith.addf %219, %223 : vector<8x256xf32>
    %c0_150 = arith.constant 0 : index
    %c143_151 = arith.constant 143 : index
    %225 = vector.load %arg9[%c0_150, %c143_151] : memref<8x512xf32, #tpu.memory_space<vmem>>, vector<8x256xf32>
    %226 = vector.broadcast %24 : vector<1x256xf32> to vector<8x256xf32>
    %227 = arith.mulf %225, %226 : vector<8x256xf32>
    %cst_152 = arith.constant dense<0.000000e+00> : vector<8x256xf32>
    %228 = tpu.matmul %42, %227, %cst_152 {dimension_numbers = #tpu.dot_dimension_numbers<[1], [0], [0], [1], [0, 0, 1, 1], [], []>} : vector<8x8xf32>, vector<8x256xf32>, vector<8x256xf32> -> vector<8x256xf32>
    %229 = arith.addf %224, %228 : vector<8x256xf32>
    %c0_153 = arith.constant 0 : index
    %c144_154 = arith.constant 144 : index
    %230 = vector.load %arg9[%c0_153, %c144_154] : memref<8x512xf32, #tpu.memory_space<vmem>>, vector<8x256xf32>
    %cst_155 = arith.constant dense<0.000000e+00> : vector<8x256xf32>
    %231 = tpu.matmul %44, %230, %cst_155 {dimension_numbers = #tpu.dot_dimension_numbers<[1], [0], [0], [1], [0, 0, 1, 1], [], []>} : vector<8x8xf32>, vector<8x256xf32>, vector<8x256xf32> -> vector<8x256xf32>
    %232 = arith.addf %229, %231 : vector<8x256xf32>
    %c0_156 = arith.constant 0 : index
    %c145_157 = arith.constant 145 : index
    %233 = vector.load %arg9[%c0_156, %c145_157] : memref<8x512xf32, #tpu.memory_space<vmem>>, vector<8x256xf32>
    %234 = vector.broadcast %28 : vector<1x256xf32> to vector<8x256xf32>
    %235 = arith.mulf %233, %234 : vector<8x256xf32>
    %cst_158 = arith.constant dense<0.000000e+00> : vector<8x256xf32>
    %236 = tpu.matmul %46, %235, %cst_158 {dimension_numbers = #tpu.dot_dimension_numbers<[1], [0], [0], [1], [0, 0, 1, 1], [], []>} : vector<8x8xf32>, vector<8x256xf32>, vector<8x256xf32> -> vector<8x256xf32>
    %237 = arith.addf %232, %236 : vector<8x256xf32>
    %cst_159 = arith.constant dense<0.000000e+00> : vector<8xf32>
    %238 = vector.multi_reduction <add>, %237, %cst_159 [1] : vector<8x256xf32> to vector<8xf32>
    %239 = vector.shape_cast %238 : vector<8xf32> to vector<8x1xf32>
    %240 = arith.mulf %237, %237 : vector<8x256xf32>
    %cst_160 = arith.constant dense<0.000000e+00> : vector<8xf32>
    %241 = vector.multi_reduction <add>, %240, %cst_160 [1] : vector<8x256xf32> to vector<8xf32>
    %242 = vector.shape_cast %241 : vector<8xf32> to vector<8x1xf32>
    %cst_161 = arith.constant 3.906250e-03 : f32
    %243 = vector.broadcast %cst_161 : f32 to vector<8x1xf32>
    %244 = arith.mulf %239, %243 : vector<8x1xf32>
    %cst_162 = arith.constant 3.906250e-03 : f32
    %245 = vector.broadcast %cst_162 : f32 to vector<8x1xf32>
    %246 = arith.mulf %242, %245 : vector<8x1xf32>
    %247 = arith.mulf %244, %244 : vector<8x1xf32>
    %248 = arith.subf %246, %247 : vector<8x1xf32>
    %cst_163 = arith.constant 9.99999974E-6 : f32
    %249 = vector.broadcast %cst_163 : f32 to vector<8x1xf32>
    %250 = arith.addf %248, %249 : vector<8x1xf32>
    %251 = math.rsqrt %250 : vector<8x1xf32>
    %252 = arith.mulf %65, %251 : vector<8x1xf32>
    %253 = arith.mulf %244, %252 : vector<8x1xf32>
    %254 = arith.subf %66, %253 : vector<8x1xf32>
    %255 = vector.broadcast %252 : vector<8x1xf32> to vector<8x256xf32>
    %256 = arith.mulf %237, %255 : vector<8x256xf32>
    %257 = vector.broadcast %254 : vector<8x1xf32> to vector<8x256xf32>
    %258 = arith.addf %256, %257 : vector<8x256xf32>
    %cst_164 = arith.constant 0.000000e+00 : f32
    %259 = vector.broadcast %cst_164 : f32 to vector<8x256xf32>
    %260 = arith.maximumf %258, %259 : vector<8x256xf32>
    %c0_165 = arith.constant 0 : index
    %c128_166 = arith.constant 128 : index
    %261 = vector.load %arg9[%c0_165, %c128_166] : memref<8x512xf32, #tpu.memory_space<vmem>>, vector<8x256xf32>
    tpu.vector_store %arg9[%c0_165, %c128_166], %260 {strides = array<i32>} : memref<8x512xf32, #tpu.memory_space<vmem>>, vector<8x256xf32>,
    %c0_167 = arith.constant 0 : index
    %c111_168 = arith.constant 111 : index
    %262 = vector.load %arg9[%c0_167, %c111_168] : memref<8x512xf32, #tpu.memory_space<vmem>>, vector<8x256xf32>
    %263 = vector.broadcast %24 : vector<1x256xf32> to vector<8x256xf32>
    %264 = arith.mulf %262, %263 : vector<8x256xf32>
    %cst_169 = arith.constant dense<0.000000e+00> : vector<8x256xf32>
    %265 = tpu.matmul %48, %264, %cst_169 {dimension_numbers = #tpu.dot_dimension_numbers<[1], [0], [0], [1], [0, 0, 1, 1], [], []>} : vector<8x8xf32>, vector<8x256xf32>, vector<8x256xf32> -> vector<8x256xf32>
    %c0_170 = arith.constant 0 : index
    %c112_171 = arith.constant 112 : index
    %266 = vector.load %arg9[%c0_170, %c112_171] : memref<8x512xf32, #tpu.memory_space<vmem>>, vector<8x256xf32>
    %cst_172 = arith.constant dense<0.000000e+00> : vector<8x256xf32>
    %267 = tpu.matmul %50, %266, %cst_172 {dimension_numbers = #tpu.dot_dimension_numbers<[1], [0], [0], [1], [0, 0, 1, 1], [], []>} : vector<8x8xf32>, vector<8x256xf32>, vector<8x256xf32> -> vector<8x256xf32>
    %268 = arith.addf %265, %267 : vector<8x256xf32>
    %c0_173 = arith.constant 0 : index
    %c113_174 = arith.constant 113 : index
    %269 = vector.load %arg9[%c0_173, %c113_174] : memref<8x512xf32, #tpu.memory_space<vmem>>, vector<8x256xf32>
    %270 = vector.broadcast %28 : vector<1x256xf32> to vector<8x256xf32>
    %271 = arith.mulf %269, %270 : vector<8x256xf32>
    %cst_175 = arith.constant dense<0.000000e+00> : vector<8x256xf32>
    %272 = tpu.matmul %52, %271, %cst_175 {dimension_numbers = #tpu.dot_dimension_numbers<[1], [0], [0], [1], [0, 0, 1, 1], [], []>} : vector<8x8xf32>, vector<8x256xf32>, vector<8x256xf32> -> vector<8x256xf32>
    %273 = arith.addf %268, %272 : vector<8x256xf32>
    %c0_176 = arith.constant 0 : index
    %c127_177 = arith.constant 127 : index
    %274 = vector.load %arg9[%c0_176, %c127_177] : memref<8x512xf32, #tpu.memory_space<vmem>>, vector<8x256xf32>
    %275 = vector.broadcast %24 : vector<1x256xf32> to vector<8x256xf32>
    %276 = arith.mulf %274, %275 : vector<8x256xf32>
    %cst_178 = arith.constant dense<0.000000e+00> : vector<8x256xf32>
    %277 = tpu.matmul %54, %276, %cst_178 {dimension_numbers = #tpu.dot_dimension_numbers<[1], [0], [0], [1], [0, 0, 1, 1], [], []>} : vector<8x8xf32>, vector<8x256xf32>, vector<8x256xf32> -> vector<8x256xf32>
    %278 = arith.addf %273, %277 : vector<8x256xf32>
    %c0_179 = arith.constant 0 : index
    %c128_180 = arith.constant 128 : index
    %279 = vector.load %arg9[%c0_179, %c128_180] : memref<8x512xf32, #tpu.memory_space<vmem>>, vector<8x256xf32>
    %cst_181 = arith.constant dense<0.000000e+00> : vector<8x256xf32>
    %280 = tpu.matmul %56, %279, %cst_181 {dimension_numbers = #tpu.dot_dimension_numbers<[1], [0], [0], [1], [0, 0, 1, 1], [], []>} : vector<8x8xf32>, vector<8x256xf32>, vector<8x256xf32> -> vector<8x256xf32>
    %281 = arith.addf %278, %280 : vector<8x256xf32>
    %c0_182 = arith.constant 0 : index
    %c129_183 = arith.constant 129 : index
    %282 = vector.load %arg9[%c0_182, %c129_183] : memref<8x512xf32, #tpu.memory_space<vmem>>, vector<8x256xf32>
    %283 = vector.broadcast %28 : vector<1x256xf32> to vector<8x256xf32>
    %284 = arith.mulf %282, %283 : vector<8x256xf32>
    %cst_184 = arith.constant dense<0.000000e+00> : vector<8x256xf32>
    %285 = tpu.matmul %58, %284, %cst_184 {dimension_numbers = #tpu.dot_dimension_numbers<[1], [0], [0], [1], [0, 0, 1, 1], [], []>} : vector<8x8xf32>, vector<8x256xf32>, vector<8x256xf32> -> vector<8x256xf32>
    %286 = arith.addf %281, %285 : vector<8x256xf32>
    %c0_185 = arith.constant 0 : index
    %c143_186 = arith.constant 143 : index
    %287 = vector.load %arg9[%c0_185, %c143_186] : memref<8x512xf32, #tpu.memory_space<vmem>>, vector<8x256xf32>
    %288 = vector.broadcast %24 : vector<1x256xf32> to vector<8x256xf32>
    %289 = arith.mulf %287, %288 : vector<8x256xf32>
    %cst_187 = arith.constant dense<0.000000e+00> : vector<8x256xf32>
    %290 = tpu.matmul %60, %289, %cst_187 {dimension_numbers = #tpu.dot_dimension_numbers<[1], [0], [0], [1], [0, 0, 1, 1], [], []>} : vector<8x8xf32>, vector<8x256xf32>, vector<8x256xf32> -> vector<8x256xf32>
    %291 = arith.addf %286, %290 : vector<8x256xf32>
    %c0_188 = arith.constant 0 : index
    %c144_189 = arith.constant 144 : index
    %292 = vector.load %arg9[%c0_188, %c144_189] : memref<8x512xf32, #tpu.memory_space<vmem>>, vector<8x256xf32>
    %cst_190 = arith.constant dense<0.000000e+00> : vector<8x256xf32>
    %293 = tpu.matmul %62, %292, %cst_190 {dimension_numbers = #tpu.dot_dimension_numbers<[1], [0], [0], [1], [0, 0, 1, 1], [], []>} : vector<8x8xf32>, vector<8x256xf32>, vector<8x256xf32> -> vector<8x256xf32>
    %294 = arith.addf %291, %293 : vector<8x256xf32>
    %c0_191 = arith.constant 0 : index
    %c145_192 = arith.constant 145 : index
    %295 = vector.load %arg9[%c0_191, %c145_192] : memref<8x512xf32, #tpu.memory_space<vmem>>, vector<8x256xf32>
    %296 = vector.broadcast %28 : vector<1x256xf32> to vector<8x256xf32>
    %297 = arith.mulf %295, %296 : vector<8x256xf32>
    %cst_193 = arith.constant dense<0.000000e+00> : vector<8x256xf32>
    %298 = tpu.matmul %64, %297, %cst_193 {dimension_numbers = #tpu.dot_dimension_numbers<[1], [0], [0], [1], [0, 0, 1, 1], [], []>} : vector<8x8xf32>, vector<8x256xf32>, vector<8x256xf32> -> vector<8x256xf32>
    %299 = arith.addf %294, %298 : vector<8x256xf32>
    %cst_194 = arith.constant dense<0.000000e+00> : vector<8xf32>
    %300 = vector.multi_reduction <add>, %299, %cst_194 [1] : vector<8x256xf32> to vector<8xf32>
    %301 = vector.shape_cast %300 : vector<8xf32> to vector<8x1xf32>
    %302 = arith.mulf %299, %299 : vector<8x256xf32>
    %cst_195 = arith.constant dense<0.000000e+00> : vector<8xf32>
    %303 = vector.multi_reduction <add>, %302, %cst_195 [1] : vector<8x256xf32> to vector<8xf32>
    %304 = vector.shape_cast %303 : vector<8xf32> to vector<8x1xf32>
    %cst_196 = arith.constant 3.906250e-03 : f32
    %305 = vector.broadcast %cst_196 : f32 to vector<8x1xf32>
    %306 = arith.mulf %301, %305 : vector<8x1xf32>
    %cst_197 = arith.constant 3.906250e-03 : f32
    %307 = vector.broadcast %cst_197 : f32 to vector<8x1xf32>
    %308 = arith.mulf %304, %307 : vector<8x1xf32>
    %309 = arith.mulf %306, %306 : vector<8x1xf32>
    %310 = arith.subf %308, %309 : vector<8x1xf32>
    %cst_198 = arith.constant 9.99999974E-6 : f32
    %311 = vector.broadcast %cst_198 : f32 to vector<8x1xf32>
    %312 = arith.addf %310, %311 : vector<8x1xf32>
    %313 = math.rsqrt %312 : vector<8x1xf32>
    %314 = arith.mulf %67, %313 : vector<8x1xf32>
    %315 = arith.mulf %306, %314 : vector<8x1xf32>
    %316 = arith.subf %68, %315 : vector<8x1xf32>
    %317 = vector.broadcast %314 : vector<8x1xf32> to vector<8x256xf32>
    %318 = arith.mulf %299, %317 : vector<8x256xf32>
    %319 = vector.broadcast %316 : vector<8x1xf32> to vector<8x256xf32>
    %320 = arith.addf %318, %319 : vector<8x256xf32>
    %321 = arith.addf %198, %320 : vector<8x256xf32>
    %c1_199 = arith.constant 1 : index
    %c0_200 = arith.constant 0 : index
    %c0_201 = arith.constant 0 : index
    %322 = vector.load %arg8[%c1_199, %c0_200, %c0_201] : memref<2x8x256xf32, #tpu.memory_space<vmem>>, vector<1x8x256xf32>
    %323 = vector.shape_cast %322 : vector<1x8x256xf32> to vector<8x256xf32>
    %324 = vector.shape_cast %321 : vector<8x256xf32> to vector<1x8x256xf32>
    tpu.vector_store %arg8[%c1_199, %c0_200, %c0_201], %324 {strides = array<i32>} : memref<2x8x256xf32, #tpu.memory_space<vmem>>, vector<1x8x256xf32>,
    return
  }
  func.func @transform_0(%arg0: i32) -> (i32, i32, i32) {
    %c0_i32 = arith.constant 0 : i32
    %c0_i32_0 = arith.constant 0 : i32
    %c0_i32_1 = arith.constant 0 : i32
    return %arg0, %c0_i32, %c0_i32_0 : i32, i32, i32
  }
  func.func @transform_1(%arg0: i32) -> (i32, i32, i32) {
    %c0_i32 = arith.constant 0 : i32
    %c0_i32_0 = arith.constant 0 : i32
    %c0_i32_1 = arith.constant 0 : i32
    %c0_i32_2 = arith.constant 0 : i32
    return %c0_i32, %c0_i32_0, %c0_i32_1 : i32, i32, i32
  }
  func.func @transform_2(%arg0: i32) -> (i32, i32, i32) {
    %c0_i32 = arith.constant 0 : i32
    %c0_i32_0 = arith.constant 0 : i32
    %c0_i32_1 = arith.constant 0 : i32
    %c0_i32_2 = arith.constant 0 : i32
    return %c0_i32, %c0_i32_0, %c0_i32_1 : i32, i32, i32
  }
  func.func @transform_3(%arg0: i32) -> (i32, i32) {
    %c0_i32 = arith.constant 0 : i32
    %c0_i32_0 = arith.constant 0 : i32
    %c0_i32_1 = arith.constant 0 : i32
    return %c0_i32, %c0_i32_0 : i32, i32
  }
  func.func @transform_4(%arg0: i32) -> (i32, i32) {
    %c0_i32 = arith.constant 0 : i32
    %c0_i32_0 = arith.constant 0 : i32
    %c0_i32_1 = arith.constant 0 : i32
    return %c0_i32, %c0_i32_0 : i32, i32
  }
  func.func @transform_5(%arg0: i32) -> (i32, i32) {
    %c0_i32 = arith.constant 0 : i32
    %c0_i32_0 = arith.constant 0 : i32
    %c0_i32_1 = arith.constant 0 : i32
    return %c0_i32, %c0_i32_0 : i32, i32
  }
  func.func @transform_6(%arg0: i32) -> (i32, i32) {
    %c0_i32 = arith.constant 0 : i32
    %c0_i32_0 = arith.constant 0 : i32
    %c0_i32_1 = arith.constant 0 : i32
    return %c0_i32, %c0_i32_0 : i32, i32
  }
  func.func @transform_7(%arg0: i32) -> (i32, i32, i32) {
    %c0_i32 = arith.constant 0 : i32
    %c0_i32_0 = arith.constant 0 : i32
    %c0_i32_1 = arith.constant 0 : i32
    return %arg0, %c0_i32, %c0_i32_0 : i32, i32, i32
  }
}

</mosaic_0001>

<bundles_post_ra>
// kernel: tpu_custom_call.1
= control target key start
LH: loop header
LB: loop body
LE: loop exit
PB: predicated region body
PF: predicated region fallthrough
CT: control target
= control target key end

     0   :  { %v29_v0 = vlaneseq  ;;  %s3465_s0 = inlined_call_operand.vmem [shape: f32[2,8,256], index: 0, kind: input, shape index: {}]   ;;  %s3466_s1 = inlined_call_operand.vmem [shape: f32[9,8,8], index: 1, kind: input, shape index: {}]   ;;  %s3467_s2 = inlined_call_operand.vmem [shape: f32[9,8,8], index: 2, kind: input, shape index: {}]   ;;  %s3468_s3 = inlined_call_operand.vmem [shape: f32[8,1], index: 3, kind: input, shape index: {}]   ;;  %s3469_s4 = inlined_call_operand.vmem [shape: f32[8,1], index: 4, kind: input, shape index: {}]   ;;  %s3470_s5 = inlined_call_operand.vmem [shape: f32[8,1], index: 5, kind: input, shape index: {}]   ;;  %s3471_s6 = inlined_call_operand.vmem [shape: f32[8,1], index: 6, kind: input, shape index: {}]   ;;  %s3472_s7 = inlined_call_operand.hbm [shape: f32[2,8,256], index: 7, kind: output, shape index: {}]  }
   0x1   :  { %12 = vsyncpa [#allocation4], 0  ;;  %v2770_v5 = vmov 0.0   ;;  %s2771_s24 = smov 111   ;;  %s2772_s25 = smov 127   ;;  %v2835_v12 = vld [vmem:[%s3465_s0] sm:$0xff] }
   0x2   :  { %v30_v1 = vand.u32 127, %v29_v0  ;;  %s2773_s26 = smov 15   ;;  %s2774_s27 = smov 113   ;;  %v2569_v13 = vpack.i.bf16 %v2835_v12, %v2770_v5  ;;  %v2842_v14 = vld [vmem:[%s3465_s0 + $0x8] sm:$0xff]  ;;  %vm119_vm4 = vcmask 908288   ;;  %vm319_vm5 = vcmask 1039360  }
   0x3   :  { %s2775_s28 = smov 1   ;;  %s2776_s29 = smov 17   ;;  %vm248_vm6 = vcmask 924672   ;;  %vm265_vm7 = vcmask 121856   ;;  %vm336_vm8 = vcmask 7168   ;;  %v2594_v56 = vpack.i.bf16 %v2842_v14, %v2835_v12 }
   0x4   :  { %v31_v2 = vadd.s32 128, %v30_v1  ;;  %v36_v3 = vand.u32 15, %v30_v1  ;;  %s2777_s11 = smov 16   ;;  %vm194_vm9 = vcmask 138240   ;;  %s2778_s12 = smov 112   ;;  %vm136_vm10 = vcmask 130048  }
   0x5   :  { %vm141_vm11 = vcmask 64512   ;;  %vm581_vm12 = vcmask 916480   ;;  %s2421_s21 = sshll.u32 %s3472_s7, 4  ;;  %s2780_s22 = smov [#allocation3]   ;;  %s2422_s21 = int_to_ptr.hbm [resolvable:$true] %s2421_s21 }
   0x6   :  { %v43_v4 = vand.u32 15, %v31_v2  ;;  %vm56_vm0 = vcmp.ne.s32.totalorder %v36_v3, 0  ;;  %vm62_vm2 = vcmp.ne.s32.totalorder %v36_v3, 15  ;;  %s2419_s23 = sshll.u32 %s2780_s22, 4  ;;  %s2781_s13 = smov 256   ;;  %s2420_s23 = int_to_ptr.vmem [resolvable:$true] %s2419_s23 }
   0x7   :  { %v2433_v6 = vsel %vm56_vm0, 1.0, %v2770_v5  ;;  %v2435_v9 = vsel %vm62_vm2, 1.0, %v2770_v5 }
   0x8   :  { %vm57_vm1 = vcmp.ne.s32.totalorder %v43_v4, 0  ;;  %vm63_vm3 = vcmp.ne.s32.totalorder %v43_v4, 15 }
   0x9   :  { %v2434_v7 = vsel %vm57_vm1, 1.0, %v2770_v5  ;;  %v2436_v10 = vsel %vm63_vm3, 1.0, %v2770_v5 }
   0xa   :  { %v2539_v8 = vpack.i.bf16 %v2434_v7, %v2433_v6  ;;  %v2544_v11 = vpack.i.bf16 %v2436_v10, %v2435_v9  ;;  %v2947_v7 = vld [vmem:[%s3466_s1 + $0x8] sm:$0xff] }
   0xc   :  { %2540 = vrot.lane.b32.xlu0 %v2539_v8, %s2771_s24  ;;  %2550 = vrot.lane.b32.xlu1 %v2539_v8, %s2772_s25 }
   0xd   :  { %2560 = vrot.lane.b32.xlu2 %v2539_v8, %s2773_s26 }
  0x14   :  { %2545 = vrot.lane.b32.xlu0 %v2544_v11, %s2774_s27  ;;  %2555 = vrot.lane.b32.xlu1 %v2544_v11, %s2775_s28 }
  0x15   :  { %2565 = vrot.lane.b32.xlu2 %v2544_v11, %s2776_s29  ;;  %v2956_v11 = vld [vmem:[%s3466_s1] sm:$0xff] }
  0x1c   :  { %2570 = vrot.lane.b32.xlu0 %v2569_v13, %s2777_s11  ;;  %134 = vrot.lane.b32.xlu1 %v2842_v14, %s2777_s11 }
  0x67   :  { %v2561_v27 = vpop.permute.xlu2 %2560 }
  0x68   :  { %v2563_v32 = vunpack.i.h.bf16 %v2561_v27  ;;  %v2875_v33 = vunpack.i.l.bf16 %v2561_v27 }
  0x6a   :  { %v2892_v43 = vsel %vm265_vm7, %v2875_v33, %v2563_v32  ;;  %v511_v47 = vmul.f32 %v2875_v33, %v2835_v12  ;;  %v2926_v59 = vmul.f32 0.0, %v2563_v32 }
  0x6b   :  { %v512_v48 = vmul.f32 %v2892_v43, %v2842_v14 }
  0x6d   :  { %v2599_v52 = vpack.i.bf16 %v512_v48, %v511_v47 }
  0x6f   :  { %v2566_v54 = vpop.permute.xlu2 %2565 }
  0x70   :  { %v2918_v55 = vunpack.i.l.bf16 %v2566_v54  ;;  %v2568_v57 = vunpack.i.h.bf16 %v2566_v54  ;;  %v2993_v54 = vld [vmem:[%s3466_s1 + $0x28] sm:$0xff] }
  0x72   :  { %v2924_v58 = vsel %vm194_vm9, %v2918_v55, %v2568_v57  ;;  %v639_v60 = vmul.f32 %v2918_v55, %v2835_v12  ;;  %v2937_v62 = vmul.f32 0.0, %v2568_v57 }
  0x73   :  { %v640_v61 = vmul.f32 %v2924_v58, %v2842_v14 }
  0x75   :  { %v2604_v63 = vpack.i.bf16 %v640_v61, %v639_v60 }
  0x7e   :  { %v2541_v15 = vpop.permute.xlu0 %2540  ;;  %v2551_v16 = vpop.permute.xlu1 %2550 }
  0x7f   :  { %v2847_v17 = vunpack.i.h.bf16 %v2541_v15  ;;  %v2542_v18 = vunpack.i.l.bf16 %v2541_v15  ;;  %v2849_v19 = vunpack.i.h.bf16 %v2551_v16  ;;  %v2552_v20 = vunpack.i.l.bf16 %v2551_v16 }
  0x81   :  { %v2853_v21 = vsel %vm119_vm4, %v2542_v18, %v2847_v17  ;;  %v2855_v22 = vmul.f32 0.0, %v2542_v18  ;;  %v126_v23 = vmul.f32 %v2847_v17, %v2842_v14  ;;  %v326_v24 = vmul.f32 %v2849_v19, %v2842_v14 }
  0x82   :  { %v125_v25 = vmul.f32 %v2853_v21, %v2835_v12  ;;  %v2865_v26 = vsel %vm319_vm5, %v2552_v20, %v2849_v19  ;;  %v2870_v29 = vmul.f32 0.0, %v2552_v20 }
  0x83   :  { %192 = vrot.lane.b32.xlu0 %v126_v23, %s2776_s29  ;;  %334 = vrot.lane.b32.xlu1 %v326_v24, %s2775_s28  ;;  %v325_v31 = vmul.f32 %v2865_v26, %v2835_v12 }
  0x84   :  { %v2574_v28 = vpack.i.bf16 %v125_v25, %v2855_v22 }
  0x85   :  { %v2584_v41 = vpack.i.bf16 %v325_v31, %v2870_v29 }
  0x86   :  { %v2546_v30 = vpop.permute.xlu0 %2545  ;;  %2575 = vrot.lane.b32.xlu2 %v2574_v28, %s2776_s29  ;;  %v2556_v34 = vpop.permute.xlu1 %2555 }
  0x87   :  { %v2877_v35 = vunpack.i.h.bf16 %v2546_v30  ;;  %v2547_v36 = vunpack.i.l.bf16 %v2546_v30  ;;  %v2558_v37 = vunpack.i.h.bf16 %v2556_v34  ;;  %v2879_v38 = vunpack.i.l.bf16 %v2556_v34  ;;  %v2967_v34 = vld [vmem:[%s3466_s1 + $0x18] sm:$0xff] }
  0x89   :  { %v2883_v39 = vsel %vm248_vm6, %v2547_v36, %v2877_v35  ;;  %v2885_v40 = vmul.f32 0.0, %v2547_v36  ;;  %v2896_v44 = vsel %vm336_vm8, %v2879_v38, %v2558_v37  ;;  %v255_v46 = vmul.f32 %v2877_v35, %v2842_v14 }
  0x8a   :  { %v254_v42 = vmul.f32 %v2883_v39, %v2835_v12  ;;  %v442_v49 = vmul.f32 %v2879_v38, %v2835_v12  ;;  %v443_v50 = vmul.f32 %v2896_v44, %v2842_v14  ;;  %v2912_v51 = vmul.f32 0.0, %v2558_v37 }
  0x8b   :  { %2585 = vrot.lane.b32.xlu0 %v2584_v41, %s2775_s28 }
  0x8c   :  { %v2579_v45 = vpack.i.bf16 %v254_v42, %v2885_v40  ;;  %v2589_v53 = vpack.i.bf16 %v443_v50, %v442_v49 }
  0x8e   :  { %2580 = vrot.lane.b32.xlu1 %v2579_v45, %s2773_s26  ;;  %263 = vrot.lane.b32.xlu2 %v255_v46, %s2773_s26  ;;  %v2571_v0 = vpop.permute.xlu0 %2570  ;;  %v135_v3 = vpop.permute.xlu1 %134  ;;  %v2974_v45 = vld [vmem:[%s3466_s1 + $0x10] sm:$0xff] }
  0x8f   :  { %v2573_v1 = vunpack.i.h.bf16 %v2571_v0  ;;  %v2572_v2 = vunpack.i.l.bf16 %v2571_v0 }
  0x91   :  { %v138_v4 = vsel %vm136_vm10, %v2573_v1, %v135_v3  ;;  %v137_v6 = vsel %vm136_vm10, %v2572_v2, %v2573_v1 }
  0x92   :  { %180 = vmatpush.msra.mxu1 %v138_v4  ;;  %160 = vmatpush.msra.mxu0 %v137_v6  ;;  %v3014_v6 = vld [vmem:[%s3466_s1 + $0x38] sm:$0xff] }
  0x93   :  { %452 = vrot.lane.b32.xlu0 %v2912_v51, %s2772_s25  ;;  %2453 = vmatmul.msk.f32.vlgmr.msra.gmra.mxu0 %vm141_vm11, %v2947_v7 }
  0x94   :  { %2454 = vmatmul.msk.f32.vlgmr.msra.gmra.mxu1 %vm141_vm11, %v2947_v7 }
  0x96   :  { %2600 = vrot.lane.b32.xlu1 %v2599_v52, %s2774_s27  ;;  %2590 = vrot.lane.b32.xlu2 %v2589_v53, %s2772_s25 }
  0x9b   :  { %2595 = vrot.lane.b32.xlu0 %v2594_v56, %s2778_s12 }
  0x9e   :  { %579 = vrot.lane.b32.xlu1 %v2770_v5, %s2778_s12  ;;  %521 = vrot.lane.b32.xlu2 %v2926_v59, %s2774_s27 }
  0xa3   :  { %649 = vrot.lane.b32.xlu0 %v2937_v62, %s2771_s24 }
  0xa6   :  { %2605 = vrot.lane.b32.xlu2 %v2604_v63, %s2771_s24  ;;  %v2998_v63 = vld [vmem:[%s3466_s1 + $0x20] sm:$0xff] }
  0xe0   :  { %v2576_v8 = vpop.permute.xlu2 %2575 }
  0xe1   :  { %v2578_v9 = vunpack.i.h.bf16 %v2576_v8  ;;  %v2577_v10 = vunpack.i.l.bf16 %v2576_v8 }
  0xe3   :  { %v195_v13 = vsel %vm194_vm9, %v2577_v10, %v2578_v9  ;;  %v3021_v10 = vld [vmem:[%s3466_s1 + $0x30] sm:$0xff] }
  0xe4   :  { %217 = vmatpush.msra.mxu2 %v195_v13 }
  0xe5   :  { %2455 = vmatmul.msk.f32.vlgmr.msra.gmra.mxu2 %vm141_vm11, %v2956_v11 }
  0xe8   :  { %v264_v15 = vpop.permute.xlu2 %263 }
  0xf0   :  { %v2591_v16 = vpop.permute.xlu2 %2590 }
  0xf1   :  { %v2593_v27 = vunpack.i.h.bf16 %v2591_v16  ;;  %v2592_v28 = vunpack.i.l.bf16 %v2591_v16  ;;  %v3035_v16 = vld [vmem:[%s3466_s1 + $0x40] sm:$0xff] }
  0xf3   :  { %v454_v46 = vsel %vm319_vm5, %v2592_v28, %v2593_v27 }
  0xf5   :  { %v193_v18 = vpop.permute.xlu0 %192  ;;  %v335_v20 = vpop.permute.xlu1 %334 }
  0xf6   :  { %v196_v23 = vsel %vm194_vm9, %v2578_v9, %v193_v18 }
  0xf7   :  { %237 = vmatpush.msra.mxu3 %v196_v23 }
  0xf8   :  { %2456 = vmatmul.msk.f32.vlgmr.msra.gmra.mxu3 %vm141_vm11, %v2956_v11  ;;  %v522_v24 = vpop.permute.xlu2 %521 }
  0xfd   :  { %v2586_v25 = vpop.permute.xlu0 %2585 }
  0xfe   :  { %v2588_v30 = vunpack.i.h.bf16 %v2586_v25  ;;  %v2587_v31 = vunpack.i.l.bf16 %v2586_v25 }
 0x100   :  { %v2581_v32 = vpop.permute.xlu1 %2580  ;;  %v337_v41 = vsel %vm336_vm8, %v2587_v31, %v2588_v30  ;;  %v338_v42 = vsel %vm336_vm8, %v2588_v30, %v335_v20  ;;  %v2606_v49 = vpop.permute.xlu2 %2605 }
 0x101   :  { %v2583_v36 = vunpack.i.h.bf16 %v2581_v32  ;;  %v2582_v37 = vunpack.i.l.bf16 %v2581_v32  ;;  %359 = vmatpush.msrb.mxu2 %v337_v41  ;;  %379 = vmatpush.msrb.mxu3 %v338_v42  ;;  %v2608_v56 = vunpack.i.h.bf16 %v2606_v49  ;;  %v2607_v57 = vunpack.i.l.bf16 %v2606_v49 }
 0x102   :  { %2459 = vmatmul.msk.f32.vlgmr.msrb.gmra.mxu2 %vm141_vm11, %v2967_v34  ;;  %2460 = vmatmul.msk.f32.vlgmr.msrb.gmra.mxu3 %vm141_vm11, %v2967_v34 }
 0x103   :  { %v266_v47 = vsel %vm265_vm7, %v2582_v37, %v2583_v36  ;;  %v267_v48 = vsel %vm265_vm7, %v2583_v36, %v264_v15  ;;  %476 = vmatpush.msra.mxu2 %v454_v46  ;;  %v651_v0 = vsel %vm119_vm4, %v2607_v57, %v2608_v56 }
 0x104   :  { %288 = vmatpush.msrb.mxu0 %v266_v47  ;;  %308 = vmatpush.msrb.mxu1 %v267_v48 }
 0x105   :  { %2457 = vmatmul.msk.f32.vlgmr.msrb.gmra.mxu0 %vm141_vm11, %v2974_v45  ;;  %v453_v50 = vpop.permute.xlu0 %452  ;;  %2458 = vmatmul.msk.f32.vlgmr.msrb.gmra.mxu1 %vm141_vm11, %v2974_v45 }
 0x106   :  { %404 = vmatpush.msra.mxu0 %v2835_v12  ;;  %v455_v52 = vsel %vm319_vm5, %v2593_v27, %v453_v50  ;;  %424 = vmatpush.msra.mxu1 %v2842_v14 }
 0x107   :  { %496 = vmatpush.msra.mxu3 %v455_v52 }
 0x108   :  { %v2601_v53 = vpop.permute.xlu1 %2600 }
 0x109   :  { %v2603_v60 = vunpack.i.h.bf16 %v2601_v53  ;;  %v2602_v61 = vunpack.i.l.bf16 %v2601_v53 }
 0x10a   :  { %2463 = vmatmul.msk.f32.vlgmr.msra.gmra.mxu2 %vm141_vm11, %v2993_v54  ;;  %2464 = vmatmul.msk.f32.vlgmr.msra.gmra.mxu3 %vm141_vm11, %v2993_v54 }
 0x10b   :  { %v523_v12 = vsel %vm248_vm6, %v2602_v61, %v2603_v60  ;;  %v524_v14 = vsel %vm248_vm6, %v2603_v60, %v522_v24 }
 0x10c   :  { %545 = vmatpush.msrb.mxu0 %v523_v12  ;;  %565 = vmatpush.msrb.mxu1 %v524_v14 }
 0x10d   :  { %2461 = vmatmul.msk.f32.vlgmr.msra.gmra.mxu0 %vm141_vm11, %v2998_v63  ;;  %v2596_v1 = vpop.permute.xlu0 %2595  ;;  %2462 = vmatmul.msk.f32.vlgmr.msra.gmra.mxu1 %vm141_vm11, %v2998_v63 }
 0x10e   :  { %673 = vmatpush.msra.mxu0 %v651_v0  ;;  %v2598_v2 = vunpack.i.h.bf16 %v2596_v1  ;;  %v2597_v3 = vunpack.i.l.bf16 %v2596_v1 }
 0x110   :  { %v580_v4 = vpop.permute.xlu1 %579  ;;  %v582_v9 = vsel %vm581_vm12, %v2597_v3, %v2598_v2  ;;  %v162_v18 = vpop.f32.mrf.mxu0 }
 0x111   :  { %v583_v8 = vsel %vm581_vm12, %v2598_v2, %v580_v4  ;;  %604 = vmatpush.msrb.mxu2 %v582_v9  ;;  %v182_v20 = vpop.f32.mrf.mxu1 }
 0x112   :  { %624 = vmatpush.msrb.mxu3 %v583_v8  ;;  %2467 = vmatmul.msk.f32.vlgmr.msrb.gmra.mxu2 %vm141_vm11, %v3014_v6 }
 0x113   :  { %2468 = vmatmul.msk.f32.vlgmr.msrb.gmra.mxu3 %vm141_vm11, %v3014_v6 }
 0x115   :  { %2465 = vmatmul.msk.f32.vlgmr.msrb.gmra.mxu0 %vm141_vm11, %v3021_v10  ;;  %v650_v13 = vpop.permute.xlu0 %649  ;;  %2466 = vmatmul.msk.f32.vlgmr.msrb.gmra.mxu1 %vm141_vm11, %v3021_v10 }
 0x116   :  { %v652_v15 = vsel %vm119_vm4, %v2608_v56, %v650_v13 }
 0x117   :  { %693 = vmatpush.msra.mxu1 %v652_v15 }
 0x11d   :  { %2469 = vmatmul.msk.f32.vlgmr.msra.gmra.mxu0 %vm141_vm11, %v3035_v16  ;;  %2470 = vmatmul.msk.f32.vlgmr.msra.gmra.mxu1 %vm141_vm11, %v3035_v16 }
 0x168   :  { %v219_v23 = vpop.f32.mrf.mxu2 }
 0x169   :  { %v220_v31 = vadd.f32 %v219_v23, %v162_v18  ;;  %v2779_v23 = vmov 0  }
 0x16a   :  { %2609 = vset.pattern.permute.xlu0 %v2779_v23  ;;  %2690 = vset.pattern.permute.xlu2 %v2779_v23 }
 0x16b   :  { %2731 = vset.pattern.permute.xlu1 %v2779_v23 }
 0x17b   :  { %v239_v24 = vpop.f32.mrf.mxu3 }
 0x17c   :  { %v240_v36 = vadd.f32 %v239_v24, %v182_v20 }
 0x182   :  { %v290_v25 = vpop.f32.mrf.mxu0  ;;  %v310_v27 = vpop.f32.mrf.mxu1 }
 0x183   :  { %v313_v32 = vadd.f32 %v290_v25, %v220_v31  ;;  %v314_v42 = vadd.f32 %v310_v27, %v240_v36 }
 0x185   :  { %v361_v28 = vpop.f32.mrf.mxu2  ;;  %v381_v30 = vpop.f32.mrf.mxu3 }
 0x186   :  { %v384_v46 = vadd.f32 %v361_v28, %v313_v32  ;;  %v385_v50 = vadd.f32 %v381_v30, %v314_v42 }
 0x18a   :  { %v406_v37 = vpop.f32.mrf.mxu0  ;;  %v426_v41 = vpop.f32.mrf.mxu1 }
 0x18b   :  { %v429_v49 = vadd.f32 %v406_v37, %v384_v46  ;;  %v430_v52 = vadd.f32 %v426_v41, %v385_v50 }
 0x18d   :  { %v478_v47 = vpop.f32.mrf.mxu2  ;;  %v498_v48 = vpop.f32.mrf.mxu3 }
 0x18e   :  { %v501_v56 = vadd.f32 %v478_v47, %v429_v49  ;;  %v502_v61 = vadd.f32 %v498_v48, %v430_v52  ;;  %v3046_v47 = vld [vmem:[%s3468_s3] sm:$0xff] }
 0x192   :  { %v547_v53 = vpop.f32.mrf.mxu0  ;;  %v567_v57 = vpop.f32.mrf.mxu1 }
 0x193   :  { %v570_v60 = vadd.f32 %v547_v53, %v501_v56  ;;  %v571_v0 = vadd.f32 %v567_v57, %v502_v61  ;;  %v3052_v53 = vld [vmem:[%s3469_s4] sm:$0xff] }
 0x195   :  { %v606_v12 = vpop.f32.mrf.mxu2 }
 0x196   :  { %v626_v14 = vpop.f32.mrf.mxu3  ;;  %v629_v1 = vadd.f32 %v606_v12, %v570_v60 }
 0x197   :  { %v630_v2 = vadd.f32 %v626_v14, %v571_v0 }
 0x19a   :  { %v675_v3 = vpop.f32.mrf.mxu0  ;;  %v695_v8 = vpop.f32.mrf.mxu1 }
 0x19b   :  { %v698_v4 = vadd.f32 %v675_v3, %v629_v1  ;;  %v699_v9 = vadd.f32 %v695_v8, %v630_v2 }
 0x19d   :  { %v703_v13 = vmul.f32 %v698_v4, %v698_v4  ;;  %v700_v15 = vadd.f32 %v699_v9, %v698_v4  ;;  %v704_v18 = vmul.f32 %v699_v9, %v699_v9 }
 0x19f   :  { %701 = vadd.xlane.f32.xlu1 %v700_v15  ;;  %v705_v20 = vadd.f32 %v704_v18, %v703_v13 }
 0x1a1   :  { %706 = vadd.xlane.f32.xlu2 %v705_v20 }
 0x1b8   :  { %1103 = vrot.lane.b32.xlu1 %v2926_v59, %s2774_s27 }
 0x212   :  { %v702_v24 = vpop.xlane.xlu1 %701 }
 0x213   :  { %v708_v25 = vmul.f32 0.00390625, %v702_v24  ;;  %v3086_v24 = vld [vmem:[%s3465_s0 + $0x18] sm:$0xff] }
 0x214   :  { %v707_v27 = vpop.xlane.xlu2 %706 }
 0x215   :  { %v710_v28 = vmul.f32 %v708_v25, %v708_v25  ;;  %v709_v30 = vmul.f32 0.00390625, %v707_v27 }
 0x217   :  { %v711_v31 = vsub.f32 %v709_v30, %v710_v28 }
 0x219   :  { %v712_v32 = vadd.f32 1e-05, %v711_v31 }
 0x21b   :  { %2732 = vrsqrt.f32 %v712_v32  ;;  %vm719_vm14 = vweird.f32 %v712_v32 }
 0x221   :  { %v2733_v36 = vpop.eup %2732 }
 0x222   :  { %v714_v37 = vmul.f32 %v2733_v36, %v712_v32  ;;  %vm720_vm13 = vweird.f32 %v2733_v36 }
 0x223   :  { %vm721_vm15 = vmor %vm719_vm14, %vm720_vm13 }
 0x224   :  { %v715_v41 = vmul.f32 %v2733_v36, %v714_v37 }
 0x226   :  { %v716_v42 = vmul.f32 0.5, %v715_v41  ;;  %v3109_v41 = vld [vmem:[%s3465_s0 + $0x10] sm:$0xff] }
 0x228   :  { %v717_v46 = vsub.f32 1.5, %v716_v42  ;;  %v1435_v42 = vmul.f32 %v3109_v41, %v2883_v39 }
 0x22a   :  { %v718_v48 = vmul.f32 %v2733_v36, %v717_v46 }
 0x22c   :  { %v722_v49 = vsel %vm721_vm15, %v2733_v36, %v718_v48  ;;  %v2660_v48 = vpack.i.bf16 %v1435_v42, %v2885_v40  ;;  %v3179_v42 = vld [vmem:[%s3467_s2] sm:$0xff] }
 0x22d   :  { %v723_v50 = vmul.f32 %v722_v49, %v3046_v47 }
 0x22f   :  { %728 = vperm.xlu0 %2609, %v723_v50   ;;  %v724_v52 = vmul.f32 %v723_v50, %v708_v25  ;;  %v2645_v50 = vpack.i.bf16 %v3109_v41, %v2770_v5 }
 0x231   :  { %v725_v56 = vsub.f32 %v3052_v53, %v724_v52  ;;  %v1494_v52 = vmul.f32 %v2849_v19, %v3086_v24 }
 0x237   :  { %735 = vperm.xlu0 %2609, %v725_v56  }
 0x23f   :  { %1042 = vrot.lane.b32.xlu0 %v2912_v51, %s2772_s25 }
 0x2a1   :  { %v729_v57 = vpop.permute.xlu0 %728 }
 0x2a2   :  { %v731_v60 = vmul.f32 %v729_v57, %v698_v4  ;;  %v732_v61 = vmul.f32 %v729_v57, %v699_v9  ;;  %v1327_v57 = vmul.f32 %v2847_v17, %v3086_v24 }
 0x2a9   :  { %v736_v12 = vpop.permute.xlu0 %735 }
 0x2aa   :  { %v738_v14 = vadd.f32 %v736_v12, %v731_v60  ;;  %v739_v0 = vadd.f32 %v736_v12, %v732_v61  ;;  %v1653_v60 = vmul.f32 %v2875_v33, %v3109_v41  ;;  %v1654_v61 = vmul.f32 %v3086_v24, %v2892_v43 }
 0x2ab   :  { %v1493_v12 = vmul.f32 %v3109_v41, %v2865_v26 }
 0x2ac   :  { %v3057_v1 = vmax.f32 %v738_v14, 0.0  ;;  %v3059_v2 = vmax.f32 %v739_v0, 0.0  ;;  %v2675_v14 = vpack.i.bf16 %v1654_v61, %v1653_v60 }
 0x2ad   :  { %v2665_v0 = vpack.i.bf16 %v1493_v12, %v2870_v29 }
 0x2ae   :  { %v749_v3 = vmul.f32 %v2847_v17, %v3059_v2  ;;  %v2610_v8 = vpack.i.bf16 %v3057_v1, %v2770_v5  ;;  %v748_v13 = vmul.f32 %v3057_v1, %v2853_v21  ;;  %v1032_v9 = vmul.f32 %v2879_v38, %v3057_v1 }
 0x2af   :  { %v1033_v15 = vmul.f32 %v3059_v2, %v2896_v44  ;;  %v863_v20 = vmul.f32 %v3057_v1, %v2883_v39  ;;  %v925_v25 = vmul.f32 %v2849_v19, %v3059_v2  ;;  %v1212_v27 = vmul.f32 %v2918_v55, %v3057_v1 }
 0x2b0   :  { %813 = vrot.lane.b32.xlu1 %v749_v3, %s2776_s29  ;;  %2611 = vrot.lane.b32.xlu0 %v2610_v8, %s2777_s11  ;;  %v2615_v4 = vpack.i.bf16 %v748_v13, %v2855_v22  ;;  %v1213_v28 = vmul.f32 %v3059_v2, %v2924_v58  ;;  %v1093_v30 = vmul.f32 %v2875_v33, %v3057_v1 }
 0x2b1   :  { %v2635_v18 = vpack.i.bf16 %v1033_v15, %v1032_v9  ;;  %v2620_v23 = vpack.i.bf16 %v863_v20, %v2885_v40  ;;  %v1094_v31 = vmul.f32 %v3059_v2, %v2892_v43  ;;  %v864_v36 = vmul.f32 %v2877_v35, %v3059_v2 }
 0x2b2   :  { %2616 = vrot.lane.b32.xlu2 %v2615_v4, %s2776_s29  ;;  %v2655_v32 = vpack.i.bf16 %v1213_v28, %v1212_v27  ;;  %v924_v46 = vmul.f32 %v3057_v1, %v2865_v26  ;;  %v2630_v56 = vpack.i.bf16 %v3059_v2, %v3057_v1  ;;  %v1326_v3 = vmul.f32 %v3109_v41, %v2853_v21 }
 0x2b3   :  { %v2640_v37 = vpack.i.bf16 %v1094_v31, %v1093_v30  ;;  %v1436_v13 = vmul.f32 %v2877_v35, %v3086_v24  ;;  %v2680_v4 = vpack.i.bf16 %v3086_v24, %v3109_v41  ;;  %v1595_v9 = vmul.f32 %v2879_v38, %v3109_v41 }
 0x2b4   :  { %v2625_v49 = vpack.i.bf16 %v924_v46, %v2870_v29  ;;  %v2650_v8 = vpack.i.bf16 %v1326_v3, %v2855_v22  ;;  %v1596_v15 = vmul.f32 %v3086_v24, %v2896_v44  ;;  %v1766_v20 = vmul.f32 %v2918_v55, %v3109_v41 }
 0x2b8   :  { %757 = vrot.lane.b32.xlu0 %v3059_v2, %s2777_s11  ;;  %2636 = vrot.lane.b32.xlu1 %v2635_v18, %s2772_s25  ;;  %v2670_v18 = vpack.i.bf16 %v1596_v15, %v1595_v9 }
 0x2ba   :  { %1161 = vrot.lane.b32.xlu2 %v2770_v5, %s2778_s12 }
 0x2c0   :  { %1335 = vrot.lane.b32.xlu1 %v3086_v24, %s2777_s11  ;;  %2621 = vrot.lane.b32.xlu0 %v2620_v23, %s2773_s26  ;;  %v1767_v23 = vmul.f32 %v3086_v24, %v2924_v58 }
 0x2c2   :  { %933 = vrot.lane.b32.xlu2 %v925_v25, %s2775_s28  ;;  %v2685_v25 = vpack.i.bf16 %v1767_v23, %v1766_v20 }
 0x2c8   :  { %2656 = vrot.lane.b32.xlu1 %v2655_v32, %s2771_s24  ;;  %872 = vrot.lane.b32.xlu0 %v864_v36, %s2773_s26  ;;  %v1104_v32 = vpop.permute.xlu1 %1103  ;;  %v3172_v36 = vpop.permute.xlu0 %1042 }
 0x2ca   :  { %2641 = vrot.lane.b32.xlu2 %v2640_v37, %s2774_s27 }
 0x2d0   :  { %2661 = vrot.lane.b32.xlu1 %v2660_v48, %s2773_s26  ;;  %2626 = vrot.lane.b32.xlu0 %v2625_v49, %s2775_s28 }
 0x2d2   :  { %2646 = vrot.lane.b32.xlu2 %v2645_v50, %s2777_s11 }
 0x2d8   :  { %1502 = vrot.lane.b32.xlu1 %v1494_v52, %s2775_s28  ;;  %2631 = vrot.lane.b32.xlu0 %v2630_v56, %s2778_s12  ;;  %v3187_v56 = vld [vmem:[%s3467_s2 + $0x8] sm:$0xff] }
 0x2da   :  { %1388 = vrot.lane.b32.xlu2 %v1327_v57, %s2776_s29 }
 0x2e0   :  { %2676 = vrot.lane.b32.xlu1 %v2675_v14, %s2774_s27  ;;  %1222 = vrot.lane.b32.xlu0 %v2937_v62, %s2771_s24 }
 0x2e2   :  { %2666 = vrot.lane.b32.xlu2 %v2665_v0, %s2775_s28 }
 0x2e8   :  { %2651 = vrot.lane.b32.xlu0 %v2650_v8, %s2776_s29  ;;  %1718 = vrot.lane.b32.xlu1 %v2770_v5, %s2778_s12 }
 0x2ea   :  { %1605 = vrot.lane.b32.xlu2 %v2912_v51, %s2772_s25 }
 0x2f0   :  { %1444 = vrot.lane.b32.xlu0 %v1436_v13, %s2773_s26 }
 0x2f2   :  { %2681 = vrot.lane.b32.xlu2 %v2680_v4, %s2778_s12 }
 0x2f8   :  { %2671 = vrot.lane.b32.xlu0 %v2670_v18, %s2772_s25  ;;  %v3200_v18 = vld [vmem:[%s3467_s2 + $0x10] sm:$0xff] }
 0x2fa   :  { %1776 = vrot.lane.b32.xlu2 %v2937_v62, %s2771_s24 }
 0x300   :  { %1663 = vrot.lane.b32.xlu0 %v2926_v59, %s2774_s27 }
 0x308   :  { %2686 = vrot.lane.b32.xlu0 %v2685_v25, %s2771_s24 }
 0x30c   :  { %v2617_v27 = vpop.permute.xlu2 %2616 }
 0x30d   :  { %v2619_v28 = vunpack.i.h.bf16 %v2617_v27  ;;  %v2618_v30 = vunpack.i.l.bf16 %v2617_v27 }
 0x30f   :  { %v815_v31 = vsel %vm194_vm9, %v2618_v30, %v2619_v28 }
 0x310   :  { %837 = vmatpush.msrb.mxu0 %v815_v31 }
 0x311   :  { %2473 = vmatmul.msk.f32.vlgmr.msrb.gmra.mxu0 %vm141_vm11, %v3179_v42 }
 0x314   :  { %v3174_v37 = vpop.permute.xlu2 %1161 }
 0x31c   :  { %v934_v60 = vpop.permute.xlu2 %933 }
 0x322   :  { %v2612_v46 = vpop.permute.xlu0 %2611  ;;  %v814_v48 = vpop.permute.xlu1 %813 }
 0x323   :  { %v2614_v49 = vunpack.i.h.bf16 %v2612_v46  ;;  %v2613_v50 = vunpack.i.l.bf16 %v2612_v46  ;;  %v816_v52 = vsel %vm194_vm9, %v2619_v28, %v814_v48  ;;  %v3211_v46 = vld [vmem:[%s3467_s2 + $0x20] sm:$0xff] }
 0x324   :  { %857 = vmatpush.msrb.mxu1 %v816_v52  ;;  %v2642_v0 = vpop.permute.xlu2 %2641 }
 0x325   :  { %v759_v57 = vsel %vm136_vm10, %v2613_v50, %v2614_v49  ;;  %2474 = vmatmul.msk.f32.vlgmr.msrb.gmra.mxu1 %vm141_vm11, %v3179_v42  ;;  %v2644_v9 = vunpack.i.h.bf16 %v2642_v0  ;;  %v2643_v15 = vunpack.i.l.bf16 %v2642_v0  ;;  %v3223_v0 = vld [vmem:[%s3467_s2 + $0x18] sm:$0xff] }
 0x326   :  { %781 = vmatpush.msra.mxu2 %v759_v57 }
 0x327   :  { %2471 = vmatmul.msk.f32.vlgmr.msra.gmra.mxu2 %vm141_vm11, %v3187_v56  ;;  %v1105_v23 = vsel %vm248_vm6, %v2643_v15, %v2644_v9  ;;  %v1106_v48 = vsel %vm248_vm6, %v2644_v9, %v1104_v32 }
 0x32a   :  { %v758_v61 = vpop.permute.xlu0 %757  ;;  %v2637_v12 = vpop.permute.xlu1 %2636 }
 0x32b   :  { %v760_v14 = vsel %vm136_vm10, %v2614_v49, %v758_v61  ;;  %v2639_v52 = vunpack.i.h.bf16 %v2637_v12  ;;  %v2638_v57 = vunpack.i.l.bf16 %v2637_v12  ;;  %v3232_v12 = vld [vmem:[%s3467_s2 + $0x30] sm:$0xff] }
 0x32c   :  { %801 = vmatpush.msra.mxu3 %v760_v14  ;;  %v2647_v49 = vpop.permute.xlu2 %2646 }
 0x32d   :  { %2472 = vmatmul.msk.f32.vlgmr.msra.gmra.mxu3 %vm141_vm11, %v3187_v56  ;;  %v2649_v9 = vunpack.i.h.bf16 %v2647_v49 }
 0x332   :  { %v2622_v3 = vpop.permute.xlu0 %2621  ;;  %v1336_v8 = vpop.permute.xlu1 %1335 }
 0x333   :  { %v2624_v13 = vunpack.i.h.bf16 %v2622_v3  ;;  %v2623_v4 = vunpack.i.l.bf16 %v2622_v3  ;;  %v1044_v3 = vsel %vm319_vm5, %v2638_v57, %v2639_v52 }
 0x334   :  { %v1389_v15 = vpop.permute.xlu2 %1388 }
 0x335   :  { %v874_v20 = vsel %vm265_vm7, %v2623_v4, %v2624_v13 }
 0x336   :  { %896 = vmatpush.msrb.mxu2 %v874_v20 }
 0x337   :  { %2475 = vmatmul.msk.f32.vlgmr.msrb.gmra.mxu2 %vm141_vm11, %v3200_v18 }
 0x338   :  { %1002 = vmatpush.msra.mxu2 %v3057_v1 }
 0x33a   :  { %1127 = vmatpush.msrb.mxu2 %v1105_v23  ;;  %v873_v25 = vpop.permute.xlu0 %872  ;;  %v2657_v27 = vpop.permute.xlu1 %2656 }
 0x33b   :  { %v875_v28 = vsel %vm265_vm7, %v2624_v13, %v873_v25  ;;  %v2659_v30 = vunpack.i.h.bf16 %v2657_v27  ;;  %v2658_v31 = vunpack.i.l.bf16 %v2657_v27  ;;  %v1045_v13 = vsel %vm319_vm5, %v2639_v52, %v3172_v36  ;;  %v3246_v25 = vld [vmem:[%s3467_s2 + $0x28] sm:$0xff] }
 0x33c   :  { %916 = vmatpush.msrb.mxu3 %v875_v28  ;;  %v2667_v57 = vpop.permute.xlu2 %2666 }
 0x33d   :  { %2476 = vmatmul.msk.f32.vlgmr.msrb.gmra.mxu3 %vm141_vm11, %v3200_v18  ;;  %v1224_v1 = vsel %vm119_vm4, %v2658_v31, %v2659_v30 }
 0x33e   :  { %1022 = vmatpush.msra.mxu3 %v3059_v2 }
 0x33f   :  { %2479 = vmatmul.msk.f32.vlgmr.msra.gmra.mxu2 %vm141_vm11, %v3211_v46 }
 0x340   :  { %1147 = vmatpush.msrb.mxu3 %v1106_v48  ;;  %1246 = vmatpush.msra.mxu2 %v1224_v1  ;;  %v3257_v1 = vld [vmem:[%s3467_s2 + $0x40] sm:$0xff]  ;;  %v1338_v48 = vsel %vm136_vm10, %v2649_v9, %v1336_v8  ;;  %v3270_v8 = vld [vmem:[%s3467_s2 + $0x38] sm:$0xff] }
 0x342   :  { %v2627_v50 = vpop.permute.xlu0 %2626  ;;  %v2662_v27 = vpop.permute.xlu1 %2661 }
 0x343   :  { %v2629_v61 = vunpack.i.h.bf16 %v2627_v50  ;;  %v2628_v14 = vunpack.i.l.bf16 %v2627_v50  ;;  %v2663_v50 = vunpack.i.l.bf16 %v2662_v27 }
 0x345   :  { %2480 = vmatmul.msk.f32.vlgmr.msra.gmra.mxu3 %vm141_vm11, %v3211_v46  ;;  %v935_v2 = vsel %vm336_vm8, %v2628_v14, %v2629_v61  ;;  %v936_v32 = vsel %vm336_vm8, %v2629_v61, %v934_v60  ;;  %v2648_v60 = vunpack.i.l.bf16 %v2647_v49  ;;  %v2664_v49 = vunpack.i.h.bf16 %v2662_v27 }
 0x346   :  { %957 = vmatpush.msra.mxu0 %v935_v2  ;;  %977 = vmatpush.msra.mxu1 %v936_v32 }
 0x347   :  { %2477 = vmatmul.msk.f32.vlgmr.msra.gmra.mxu0 %vm141_vm11, %v3223_v0  ;;  %2478 = vmatmul.msk.f32.vlgmr.msra.gmra.mxu1 %vm141_vm11, %v3223_v0  ;;  %v1337_v31 = vsel %vm136_vm10, %v2648_v60, %v2649_v9  ;;  %v1446_v14 = vsel %vm265_vm7, %v2663_v50, %v2664_v49  ;;  %v1606_v9 = vpop.permute.xlu2 %1605 }
 0x348   :  { %1066 = vmatpush.msrb.mxu0 %v1044_v3  ;;  %1086 = vmatpush.msrb.mxu1 %v1045_v13  ;;  %v2669_v3 = vunpack.i.h.bf16 %v2667_v57  ;;  %v2668_v13 = vunpack.i.l.bf16 %v2667_v57 }
 0x349   :  { %2483 = vmatmul.msk.f32.vlgmr.msrb.gmra.mxu2 %vm141_vm11, %v3232_v12 }
 0x34a   :  { %v2632_v4 = vpop.permute.xlu0 %2631  ;;  %v1503_v61 = vpop.permute.xlu1 %1502 }
 0x34b   :  { %v2634_v20 = vunpack.i.h.bf16 %v2632_v4  ;;  %v2633_v23 = vunpack.i.l.bf16 %v2632_v4 }
 0x34d   :  { %2484 = vmatmul.msk.f32.vlgmr.msrb.gmra.mxu3 %vm141_vm11, %v3232_v12  ;;  %v1163_v36 = vsel %vm581_vm12, %v2633_v23, %v2634_v20  ;;  %v1164_v28 = vsel %vm581_vm12, %v2634_v20, %v3174_v37  ;;  %v1505_v20 = vsel %vm336_vm8, %v2669_v3, %v1503_v61  ;;  %v1504_v23 = vsel %vm336_vm8, %v2668_v13, %v2669_v3 }
 0x34e   :  { %1185 = vmatpush.msra.mxu0 %v1163_v36  ;;  %1205 = vmatpush.msra.mxu1 %v1164_v28 }
 0x34f   :  { %2481 = vmatmul.msk.f32.vlgmr.msrb.gmra.mxu0 %vm141_vm11, %v3246_v25  ;;  %2482 = vmatmul.msk.f32.vlgmr.msrb.gmra.mxu1 %vm141_vm11, %v3246_v25 }
 0x350   :  { %1376 = vmatpush.msrb.mxu1 %v1338_v48  ;;  %1356 = vmatpush.msrb.mxu0 %v1337_v31 }
 0x351   :  { %2487 = vmatmul.msk.f32.vlgmr.msra.gmra.mxu2 %vm141_vm11, %v3257_v1 }
 0x352   :  { %v1223_v37 = vpop.permute.xlu0 %1222 }
 0x353   :  { %v1225_v52 = vsel %vm119_vm4, %v2659_v30, %v1223_v37 }
 0x354   :  { %1266 = vmatpush.msra.mxu3 %v1225_v52 }
 0x355   :  { %2488 = vmatmul.msk.f32.vlgmr.msra.gmra.mxu3 %vm141_vm11, %v3257_v1 }
 0x357   :  { %2485 = vmatmul.msk.f32.vlgmr.msra.gmra.mxu0 %vm141_vm11, %v3270_v8  ;;  %2486 = vmatmul.msk.f32.vlgmr.msra.gmra.mxu1 %vm141_vm11, %v3270_v8 }
 0x358   :  { %1465 = vmatpush.msra.mxu0 %v1446_v14 }
 0x35a   :  { %v2652_v30 = vpop.permute.xlu0 %2651 }
 0x35b   :  { %v2654_v2 = vunpack.i.h.bf16 %v2652_v30  ;;  %v2653_v32 = vunpack.i.l.bf16 %v2652_v30 }
 0x35d   :  { %v1390_v60 = vsel %vm194_vm9, %v2653_v32, %v2654_v2  ;;  %v1391_v4 = vsel %vm194_vm9, %v2654_v2, %v1389_v15  ;;  %v2677_v15 = vpop.permute.xlu1 %2676 }
 0x35e   :  { %1409 = vmatpush.msrb.mxu2 %v1390_v60  ;;  %1429 = vmatpush.msrb.mxu3 %v1391_v4  ;;  %v2679_v28 = vunpack.i.h.bf16 %v2677_v15 }
 0x35f   :  { %2491 = vmatmul.msk.f32.vlgmr.msrb.gmra.mxu0 %vm141_vm11, %v2947_v7  ;;  %2492 = vmatmul.msk.f32.vlgmr.msrb.gmra.mxu1 %vm141_vm11, %v2947_v7  ;;  %v2678_v7 = vunpack.i.l.bf16 %v2677_v15 }
 0x360   :  { %2493 = vmatmul.msk.f32.vlgmr.msrb.gmra.mxu2 %vm141_vm11, %v2956_v11  ;;  %2494 = vmatmul.msk.f32.vlgmr.msrb.gmra.mxu3 %vm141_vm11, %v2956_v11 }
 0x361   :  { %1523 = vmatpush.msra.mxu2 %v1504_v23  ;;  %1543 = vmatpush.msra.mxu3 %v1505_v20  ;;  %v1665_v11 = vsel %vm248_vm6, %v2678_v7, %v2679_v28 }
 0x362   :  { %v1445_v27 = vpop.permute.xlu0 %1444  ;;  %1565 = vmatpush.msrb.mxu0 %v3109_v41  ;;  %v2682_v41 = vpop.permute.xlu2 %2681 }
 0x363   :  { %v1447_v36 = vsel %vm265_vm7, %v2664_v49, %v1445_v27  ;;  %v2684_v31 = vunpack.i.h.bf16 %v2682_v41  ;;  %v2683_v48 = vunpack.i.l.bf16 %v2682_v41 }
 0x364   :  { %1485 = vmatpush.msra.mxu1 %v1447_v36 }
 0x365   :  { %v1719_v50 = vpop.permute.xlu1 %1718 }
 0x366   :  { %1585 = vmatpush.msrb.mxu1 %v3086_v24  ;;  %v1721_v57 = vsel %vm581_vm12, %v2684_v31, %v1719_v50 }
 0x367   :  { %2495 = vmatmul.msk.f32.vlgmr.msra.gmra.mxu0 %vm141_vm11, %v2974_v45  ;;  %2496 = vmatmul.msk.f32.vlgmr.msra.gmra.mxu1 %vm141_vm11, %v2974_v45 }
 0x368   :  { %2497 = vmatmul.msk.f32.vlgmr.msra.gmra.mxu2 %vm141_vm11, %v2967_v34  ;;  %2498 = vmatmul.msk.f32.vlgmr.msra.gmra.mxu3 %vm141_vm11, %v2967_v34  ;;  %v1720_v34 = vsel %vm581_vm12, %v2683_v48, %v2684_v31 }
 0x369   :  { %1684 = vmatpush.msra.mxu0 %v1665_v11 }
 0x36a   :  { %v2672_v37 = vpop.permute.xlu0 %2671  ;;  %v1777_v2 = vpop.permute.xlu2 %1776 }
 0x36b   :  { %v2674_v24 = vunpack.i.h.bf16 %v2672_v37  ;;  %v2673_v49 = vunpack.i.l.bf16 %v2672_v37 }
 0x36d   :  { %v1607_v52 = vsel %vm319_vm5, %v2673_v49, %v2674_v24  ;;  %v1608_v45 = vsel %vm319_vm5, %v2674_v24, %v1606_v9 }
 0x36e   :  { %1626 = vmatpush.msrb.mxu2 %v1607_v52  ;;  %1646 = vmatpush.msrb.mxu3 %v1608_v45 }
 0x36f   :  { %2499 = vmatmul.msk.f32.vlgmr.msrb.gmra.mxu0 %vm141_vm11, %v2998_v63  ;;  %2500 = vmatmul.msk.f32.vlgmr.msrb.gmra.mxu1 %vm141_vm11, %v2998_v63 }
 0x370   :  { %2501 = vmatmul.msk.f32.vlgmr.msrb.gmra.mxu2 %vm141_vm11, %v2993_v54  ;;  %2502 = vmatmul.msk.f32.vlgmr.msrb.gmra.mxu3 %vm141_vm11, %v2993_v54 }
 0x371   :  { %1739 = vmatpush.msra.mxu2 %v1720_v34  ;;  %1759 = vmatpush.msra.mxu3 %v1721_v57 }
 0x372   :  { %v1664_v61 = vpop.permute.xlu0 %1663 }
 0x373   :  { %v1666_v14 = vsel %vm248_vm6, %v2679_v28, %v1664_v61 }
 0x374   :  { %1704 = vmatpush.msra.mxu1 %v1666_v14 }
 0x377   :  { %2503 = vmatmul.msk.f32.vlgmr.msra.gmra.mxu0 %vm141_vm11, %v3021_v10  ;;  %2504 = vmatmul.msk.f32.vlgmr.msra.gmra.mxu1 %vm141_vm11, %v3021_v10 }
 0x378   :  { %2505 = vmatmul.msk.f32.vlgmr.msra.gmra.mxu2 %vm141_vm11, %v3014_v6  ;;  %2506 = vmatmul.msk.f32.vlgmr.msra.gmra.mxu3 %vm141_vm11, %v3014_v6 }
 0x37a   :  { %v2687_v63 = vpop.permute.xlu0 %2686 }
 0x37b   :  { %v2689_v54 = vunpack.i.h.bf16 %v2687_v63  ;;  %v2688_v30 = vunpack.i.l.bf16 %v2687_v63 }
 0x37d   :  { %v1778_v32 = vsel %vm119_vm4, %v2688_v30, %v2689_v54  ;;  %v1779_v3 = vsel %vm119_vm4, %v2689_v54, %v1777_v2 }
 0x37e   :  { %1797 = vmatpush.msrb.mxu0 %v1778_v32  ;;  %1817 = vmatpush.msrb.mxu1 %v1779_v3 }
 0x37f   :  { %2507 = vmatmul.msk.f32.vlgmr.msrb.gmra.mxu0 %vm141_vm11, %v3035_v16  ;;  %2508 = vmatmul.msk.f32.vlgmr.msrb.gmra.mxu1 %vm141_vm11, %v3035_v16 }
 0x38e   :  { %v839_v10 = vpop.f32.mrf.mxu0 }
 0x3a2   :  { %v859_v6 = vpop.f32.mrf.mxu1 }
 0x3aa   :  { %v783_v13 = vpop.f32.mrf.mxu2 }
 0x3ab   :  { %v840_v60 = vadd.f32 %v839_v10, %v783_v13 }
 0x3b0   :  { %v803_v4 = vpop.f32.mrf.mxu3 }
 0x3b1   :  { %v860_v9 = vadd.f32 %v859_v6, %v803_v4 }
 0x3ba   :  { %v898_v20 = vpop.f32.mrf.mxu2 }
 0x3bb   :  { %v921_v23 = vadd.f32 %v898_v20, %v840_v60 }
 0x3c0   :  { %v918_v15 = vpop.f32.mrf.mxu3 }
 0x3c1   :  { %v922_v27 = vadd.f32 %v918_v15, %v860_v9 }
 0x3c2   :  { %v1004_v36 = vpop.f32.mrf.mxu2 }
 0x3c4   :  { %v959_v28 = vpop.f32.mrf.mxu0  ;;  %v979_v7 = vpop.f32.mrf.mxu1 }
 0x3c5   :  { %v982_v11 = vadd.f32 %v959_v28, %v921_v23  ;;  %v983_v41 = vadd.f32 %v979_v7, %v922_v27 }
 0x3c7   :  { %v1027_v31 = vadd.f32 %v1004_v36, %v982_v11 }
 0x3c8   :  { %v1024_v48 = vpop.f32.mrf.mxu3 }
 0x3c9   :  { %v1028_v37 = vadd.f32 %v1024_v48, %v983_v41 }
 0x3cc   :  { %v1068_v24 = vpop.f32.mrf.mxu0  ;;  %v1088_v16 = vpop.f32.mrf.mxu1 }
 0x3cd   :  { %v1091_v49 = vadd.f32 %v1068_v24, %v1027_v31  ;;  %v1092_v50 = vadd.f32 %v1088_v16, %v1028_v37  ;;  %v1129_v52 = vpop.f32.mrf.mxu2 }
 0x3cf   :  { %v1152_v45 = vadd.f32 %v1129_v52, %v1091_v49 }
 0x3d0   :  { %v1149_v57 = vpop.f32.mrf.mxu3 }
 0x3d1   :  { %v1153_v34 = vadd.f32 %v1149_v57, %v1092_v50 }
 0x3d4   :  { %v1187_v61 = vpop.f32.mrf.mxu0  ;;  %v1207_v14 = vpop.f32.mrf.mxu1 }
 0x3d5   :  { %v1210_v63 = vadd.f32 %v1187_v61, %v1152_v45  ;;  %v1211_v54 = vadd.f32 %v1207_v14, %v1153_v34  ;;  %v1248_v30 = vpop.f32.mrf.mxu2 }
 0x3d7   :  { %v3330_v2 = vadd.f32 %v1248_v30, %v1210_v63 }
 0x3d8   :  { %v1268_v32 = vpop.f32.mrf.mxu3 }
 0x3d9   :  { %v3332_v3 = vadd.f32 %v1268_v32, %v1211_v54 }
 0x3dc   :  { %v1358_v10 = vpop.f32.mrf.mxu0  ;;  %v1378_v13 = vpop.f32.mrf.mxu1 }
 0x3e3   :  { %v1411_v60 = vpop.f32.mrf.mxu2  ;;  %v1431_v6 = vpop.f32.mrf.mxu3 }
 0x3e4   :  { %v1467_v4 = vpop.f32.mrf.mxu0  ;;  %v1487_v9 = vpop.f32.mrf.mxu1  ;;  %v1412_v20 = vadd.f32 %v1411_v60, %v1358_v10  ;;  %v1432_v23 = vadd.f32 %v1431_v6, %v1378_v13 }
 0x3e6   :  { %v1490_v7 = vadd.f32 %v1467_v4, %v1412_v20  ;;  %v1491_v11 = vadd.f32 %v1487_v9, %v1432_v23 }
 0x3eb   :  { %v1525_v15 = vpop.f32.mrf.mxu2  ;;  %v1545_v27 = vpop.f32.mrf.mxu3 }
 0x3ec   :  { %v1567_v36 = vpop.f32.mrf.mxu0  ;;  %v1587_v28 = vpop.f32.mrf.mxu1  ;;  %v1548_v41 = vadd.f32 %v1525_v15, %v1490_v7  ;;  %v1549_v31 = vadd.f32 %v1545_v27, %v1491_v11 }
 0x3ee   :  { %v1590_v24 = vadd.f32 %v1567_v36, %v1548_v41  ;;  %v1591_v16 = vadd.f32 %v1587_v28, %v1549_v31 }
 0x3f3   :  { %v1628_v48 = vpop.f32.mrf.mxu2  ;;  %v1648_v37 = vpop.f32.mrf.mxu3 }
 0x3f4   :  { %v1686_v49 = vpop.f32.mrf.mxu0  ;;  %v1706_v50 = vpop.f32.mrf.mxu1  ;;  %v1651_v52 = vadd.f32 %v1628_v48, %v1590_v24  ;;  %v1652_v45 = vadd.f32 %v1648_v37, %v1591_v16 }
 0x3f6   :  { %v1709_v57 = vadd.f32 %v1686_v49, %v1651_v52  ;;  %v1710_v34 = vadd.f32 %v1706_v50, %v1652_v45 }
 0x3fb   :  { %v1741_v61 = vpop.f32.mrf.mxu2  ;;  %v1761_v14 = vpop.f32.mrf.mxu3 }
 0x3fc   :  { %v1764_v63 = vadd.f32 %v1741_v61, %v1709_v57  ;;  %v1765_v54 = vadd.f32 %v1761_v14, %v1710_v34  ;;  %v1799_v30 = vpop.f32.mrf.mxu0  ;;  %v1819_v32 = vpop.f32.mrf.mxu1 }
 0x3fe   :  { %v1822_v10 = vadd.f32 %v1799_v30, %v1764_v63  ;;  %v1823_v13 = vadd.f32 %v1819_v32, %v1765_v54 }
 0x400   :  { %v1824_v60 = vadd.f32 %v1823_v13, %v1822_v10  ;;  %v1827_v6 = vmul.f32 %v1822_v10, %v1822_v10  ;;  %v1828_v4 = vmul.f32 %v1823_v13, %v1823_v13 }
 0x402   :  { %1825 = vadd.xlane.f32.xlu1 %v1824_v60  ;;  %v1829_v9 = vadd.f32 %v1828_v4, %v1827_v6 }
 0x404   :  { %1830 = vadd.xlane.f32.xlu0 %v1829_v9 }
 0x475   :  { %v1826_v20 = vpop.xlane.xlu1 %1825 }
 0x476   :  { %v1832_v23 = vmul.f32 0.00390625, %v1826_v20 }
 0x477   :  { %v1831_v15 = vpop.xlane.xlu0 %1830 }
 0x478   :  { %v1834_v27 = vmul.f32 %v1832_v23, %v1832_v23  ;;  %v1833_v36 = vmul.f32 0.00390625, %v1831_v15 }
 0x47a   :  { %v1835_v28 = vsub.f32 %v1833_v36, %v1834_v27 }
 0x47c   :  { %v1836_v7 = vadd.f32 1e-05, %v1835_v28 }
 0x47e   :  { %2734 = vrsqrt.f32 %v1836_v7  ;;  %vm1843_vm1 = vweird.f32 %v1836_v7 }
 0x484   :  { %v2735_v11 = vpop.eup %2734 }
 0x485   :  { %v1838_v41 = vmul.f32 %v2735_v11, %v1836_v7  ;;  %vm1844_vm0 = vweird.f32 %v2735_v11 }
 0x486   :  { %vm1845_vm2 = vmor %vm1843_vm1, %vm1844_vm0 }
 0x487   :  { %v1839_v31 = vmul.f32 %v2735_v11, %v1838_v41 }
 0x489   :  { %v1840_v48 = vmul.f32 0.5, %v1839_v31 }
 0x48b   :  { %v1841_v37 = vsub.f32 1.5, %v1840_v48 }
 0x48d   :  { %v1842_v24 = vmul.f32 %v2735_v11, %v1841_v37 }
 0x48f   :  { %v1846_v16 = vsel %vm1845_vm2, %v2735_v11, %v1842_v24 }
 0x490   :  { %v1847_v49 = vmul.f32 %v1846_v16, %v3046_v47 }
 0x492   :  { %1852 = vperm.xlu2 %2690, %v1847_v49   ;;  %v1848_v50 = vmul.f32 %v1847_v49, %v1832_v23 }
 0x494   :  { %v1849_v52 = vsub.f32 %v3052_v53, %v1848_v50 }
 0x49a   :  { %1859 = vperm.xlu2 %2690, %v1849_v52  }
 0x4ec   :  { %v1853_v45 = vpop.permute.xlu2 %1852 }
 0x4ed   :  { %v1855_v57 = vmul.f32 %v1853_v45, %v1822_v10  ;;  %v1856_v34 = vmul.f32 %v1853_v45, %v1823_v13 }
 0x4f4   :  { %v1860_v61 = vpop.permute.xlu2 %1859 }
 0x4f5   :  { %v1862_v14 = vadd.f32 %v1860_v61, %v1855_v57  ;;  %v1863_v63 = vadd.f32 %v1860_v61, %v1856_v34 }
 0x4f7   :  { %v1864_v54 = vmax.f32 %v1862_v14, 0.0  ;;  %v3336_v30 = vmax.f32 %v1863_v63, 0.0 }
 0x4f9   :  { %v1982_v32 = vmul.f32 %v2877_v35, %v3336_v30  ;;  %v1873_v47 = vmul.f32 %v2847_v17, %v3336_v30  ;;  %v2691_v60 = vpack.i.bf16 %v1864_v54, %v2770_v5  ;;  %v2199_v53 = vmul.f32 %v2875_v33, %v1864_v54 }
 0x4fa   :  { %v2200_v10 = vmul.f32 %v3336_v30, %v2892_v43  ;;  %v2312_v17 = vmul.f32 %v2918_v55, %v1864_v54  ;;  %v2313_v35 = vmul.f32 %v3336_v30, %v2924_v58  ;;  %v1981_v6 = vmul.f32 %v1864_v54, %v2883_v39 }
 0x4fb   :  { %1990 = vrot.lane.b32.xlu1 %v1982_v32, %s2773_s26  ;;  %1934 = vrot.lane.b32.xlu0 %v1873_v47, %s2776_s29  ;;  %v1872_v43 = vmul.f32 %v1864_v54, %v2853_v21  ;;  %v2039_v39 = vmul.f32 %v1864_v54, %v2865_v26  ;;  %v2040_v21 = vmul.f32 %v2849_v19, %v3336_v30 }
 0x4fc   :  { %2692 = vrot.lane.b32.xlu2 %v2691_v60, %s2777_s11  ;;  %v2711_v13 = vpack.i.bf16 %v2200_v10, %v2199_v53  ;;  %v2726_v33 = vpack.i.bf16 %v2313_v35, %v2312_v17  ;;  %v2696_v4 = vpack.i.bf16 %v1981_v6, %v2885_v40  ;;  %v1277_v26 = vmul.f32 %v3332_v3, %v3332_v3 }
 0x4fd   :  { %v2701_v55 = vpack.i.bf16 %v1872_v43, %v2855_v22  ;;  %v2706_v40 = vpack.i.bf16 %v2039_v39, %v2870_v29  ;;  %v2141_v22 = vmul.f32 %v2879_v38, %v1864_v54  ;;  %v1276_v29 = vmul.f32 %v3330_v2, %v3330_v2 }
 0x4ff   :  { %v1278_v19 = vadd.f32 %v1277_v26, %v1276_v29 }
 0x503   :  { %2209 = vrot.lane.b32.xlu1 %v2926_v59, %s2774_s27  ;;  %2712 = vrot.lane.b32.xlu0 %v2711_v13, %s2774_s27  ;;  %v2721_v59 = vpack.i.bf16 %v3336_v30, %v1864_v54 }
 0x504   :  { %1881 = vrot.lane.b32.xlu2 %v3336_v30, %s2777_s11 }
 0x50b   :  { %2727 = vrot.lane.b32.xlu1 %v2726_v33, %s2771_s24  ;;  %2151 = vrot.lane.b32.xlu0 %v2912_v51, %s2772_s25 }
 0x50c   :  { %2697 = vrot.lane.b32.xlu2 %v2696_v4, %s2773_s26 }
 0x513   :  { %2264 = vrot.lane.b32.xlu1 %v2770_v5, %s2778_s12  ;;  %2722 = vrot.lane.b32.xlu0 %v2721_v59, %s2778_s12  ;;  %v2142_v5 = vmul.f32 %v3336_v30, %v2896_v44  ;;  %v1273_v44 = vadd.f32 %v3332_v3, %v3330_v2 }
 0x514   :  { %2702 = vrot.lane.b32.xlu2 %v2701_v55, %s2776_s29 }
 0x515   :  { %v2716_v51 = vpack.i.bf16 %v2142_v5, %v2141_v22 }
 0x51c   :  { %2707 = vrot.lane.b32.xlu2 %v2706_v40, %s2775_s28 }
 0x524   :  { %2048 = vrot.lane.b32.xlu2 %v2040_v21, %s2775_s28 }
 0x52c   :  { %2717 = vrot.lane.b32.xlu2 %v2716_v51, %s2772_s25 }
 0x534   :  { %2322 = vrot.lane.b32.xlu2 %v2937_v62, %s2771_s24 }
 0x53d   :  { %1279 = vadd.xlane.f32.xlu1 %v1278_v19 }
 0x556   :  { %v2693_v58 = vpop.permute.xlu2 %2692 }
 0x557   :  { %v2695_v9 = vunpack.i.h.bf16 %v2693_v58  ;;  %v2694_v38 = vunpack.i.l.bf16 %v2693_v58 }
 0x559   :  { %v1883_v20 = vsel %vm136_vm10, %v2694_v38, %v2695_v9 }
 0x55a   :  { %1902 = vmatpush.msrb.mxu2 %v1883_v20 }
 0x55b   :  { %2509 = vmatmul.msk.f32.vlgmr.msrb.gmra.mxu2 %vm141_vm11, %v3187_v56 }
 0x55d   :  { %1274 = vadd.xlane.f32.xlu2 %v1273_v44 }
 0x55e   :  { %v1882_v62 = vpop.permute.xlu2 %1881 }
 0x55f   :  { %v1884_v23 = vsel %vm136_vm10, %v2695_v9, %v1882_v62 }
 0x560   :  { %1922 = vmatpush.msrb.mxu3 %v1884_v23 }
 0x561   :  { %2510 = vmatmul.msk.f32.vlgmr.msrb.gmra.mxu3 %vm141_vm11, %v3187_v56 }
 0x566   :  { %v2698_v15 = vpop.permute.xlu2 %2697 }
 0x567   :  { %v2700_v27 = vunpack.i.h.bf16 %v2698_v15  ;;  %v2699_v36 = vunpack.i.l.bf16 %v2698_v15 }
 0x569   :  { %v1992_v28 = vsel %vm265_vm7, %v2699_v36, %v2700_v27 }
 0x56a   :  { %2011 = vmatpush.msra.mxu2 %v1992_v28 }
 0x56b   :  { %2513 = vmatmul.msk.f32.vlgmr.msra.gmra.mxu2 %vm141_vm11, %v3200_v18 }
 0x56c   :  { %2111 = vmatpush.msrb.mxu2 %v1864_v54 }
 0x56d   :  { %v1991_v7 = vpop.permute.xlu1 %1990  ;;  %v1935_v11 = vpop.permute.xlu0 %1934 }
 0x56e   :  { %v1993_v41 = vsel %vm265_vm7, %v2700_v27, %v1991_v7  ;;  %v2703_v31 = vpop.permute.xlu2 %2702 }
 0x56f   :  { %v2705_v48 = vunpack.i.h.bf16 %v2703_v31  ;;  %v2704_v37 = vunpack.i.l.bf16 %v2703_v31  ;;  %2031 = vmatpush.msra.mxu3 %v1993_v41 }
 0x570   :  { %2514 = vmatmul.msk.f32.vlgmr.msra.gmra.mxu3 %vm141_vm11, %v3200_v18 }
 0x571   :  { %2131 = vmatpush.msrb.mxu3 %v3336_v30  ;;  %v1936_v56 = vsel %vm194_vm9, %v2704_v37, %v2705_v48  ;;  %v1937_v24 = vsel %vm194_vm9, %v2705_v48, %v1935_v11 }
 0x572   :  { %1955 = vmatpush.msra.mxu0 %v1936_v56  ;;  %1975 = vmatpush.msra.mxu1 %v1937_v24 }
 0x573   :  { %2511 = vmatmul.msk.f32.vlgmr.msra.gmra.mxu0 %vm141_vm11, %v3179_v42  ;;  %2512 = vmatmul.msk.f32.vlgmr.msra.gmra.mxu1 %vm141_vm11, %v3179_v42 }
 0x574   :  { %2517 = vmatmul.msk.f32.vlgmr.msrb.gmra.mxu2 %vm141_vm11, %v3211_v46 }
 0x575   :  { %v2210_v16 = vpop.permute.xlu1 %2209  ;;  %v2713_v49 = vpop.permute.xlu0 %2712 }
 0x576   :  { %v2715_v50 = vunpack.i.h.bf16 %v2713_v49  ;;  %v2714_v52 = vunpack.i.l.bf16 %v2713_v49  ;;  %v2708_v45 = vpop.permute.xlu2 %2707 }
 0x577   :  { %v2710_v57 = vunpack.i.h.bf16 %v2708_v45  ;;  %v2709_v34 = vunpack.i.l.bf16 %v2708_v45 }
 0x578   :  { %v2211_v18 = vsel %vm248_vm6, %v2714_v52, %v2715_v50  ;;  %v2212_v61 = vsel %vm248_vm6, %v2715_v50, %v2210_v16  ;;  %2518 = vmatmul.msk.f32.vlgmr.msrb.gmra.mxu3 %vm141_vm11, %v3211_v46 }
 0x579   :  { %v2050_v14 = vsel %vm336_vm8, %v2709_v34, %v2710_v57  ;;  %2230 = vmatpush.msra.mxu2 %v2211_v18  ;;  %2250 = vmatpush.msra.mxu3 %v2212_v61 }
 0x57a   :  { %2069 = vmatpush.msrb.mxu0 %v2050_v14 }
 0x57b   :  { %2515 = vmatmul.msk.f32.vlgmr.msrb.gmra.mxu0 %vm141_vm11, %v3223_v0 }
 0x57c   :  { %2521 = vmatmul.msk.f32.vlgmr.msra.gmra.mxu2 %vm141_vm11, %v3232_v12 }
 0x57d   :  { %v2728_v42 = vpop.permute.xlu1 %2727  ;;  %v2152_v63 = vpop.permute.xlu0 %2151 }
 0x57e   :  { %v2730_v54 = vunpack.i.h.bf16 %v2728_v42  ;;  %v2729_v30 = vunpack.i.l.bf16 %v2728_v42  ;;  %v2049_v32 = vpop.permute.xlu2 %2048 }
 0x57f   :  { %v2051_v47 = vsel %vm336_vm8, %v2710_v57, %v2049_v32 }
 0x580   :  { %2089 = vmatpush.msrb.mxu1 %v2051_v47  ;;  %v2324_v60 = vsel %vm119_vm4, %v2729_v30, %v2730_v54  ;;  %2522 = vmatmul.msk.f32.vlgmr.msra.gmra.mxu3 %vm141_vm11, %v3232_v12 }
 0x581   :  { %2516 = vmatmul.msk.f32.vlgmr.msrb.gmra.mxu1 %vm141_vm11, %v3223_v0  ;;  %2343 = vmatpush.msrb.mxu2 %v2324_v60 }
 0x584   :  { %2525 = vmatmul.msk.f32.vlgmr.msrb.gmra.mxu2 %vm141_vm11, %v3257_v1 }
 0x585   :  { %v2723_v46 = vpop.permute.xlu0 %2722  ;;  %v2265_v17 = vpop.permute.xlu1 %2264 }
 0x586   :  { %v2725_v53 = vunpack.i.h.bf16 %v2723_v46  ;;  %v2724_v10 = vunpack.i.l.bf16 %v2723_v46  ;;  %v2718_v13 = vpop.permute.xlu2 %2717 }
 0x587   :  { %v2720_v35 = vunpack.i.h.bf16 %v2718_v13  ;;  %v2719_v6 = vunpack.i.l.bf16 %v2718_v13 }
 0x588   :  { %v2267_v33 = vsel %vm581_vm12, %v2725_v53, %v2265_v17  ;;  %v2266_v43 = vsel %vm581_vm12, %v2724_v10, %v2725_v53  ;;  %v104_v10 = vld [vmem:[%s3470_s5] sm:$0xff] }
 0x589   :  { %v2153_v4 = vsel %vm319_vm5, %v2719_v6, %v2720_v35  ;;  %v2154_v0 = vsel %vm319_vm5, %v2720_v35, %v2152_v63  ;;  %v105_v6 = vld [vmem:[%s3471_s6] sm:$0xff] }
 0x58a   :  { %2172 = vmatpush.msra.mxu0 %v2153_v4  ;;  %2192 = vmatpush.msra.mxu1 %v2154_v0 }
 0x58b   :  { %2519 = vmatmul.msk.f32.vlgmr.msra.gmra.mxu0 %vm141_vm11, %v3246_v25  ;;  %2520 = vmatmul.msk.f32.vlgmr.msra.gmra.mxu1 %vm141_vm11, %v3246_v25 }
 0x58c   :  { %2285 = vmatpush.msrb.mxu0 %v2266_v43  ;;  %2305 = vmatpush.msrb.mxu1 %v2267_v33 }
 0x58e   :  { %v2323_v12 = vpop.permute.xlu2 %2322 }
 0x58f   :  { %v2325_v59 = vsel %vm119_vm4, %v2730_v54, %v2323_v12 }
 0x590   :  { %2363 = vmatpush.msrb.mxu3 %v2325_v59 }
 0x591   :  { %2526 = vmatmul.msk.f32.vlgmr.msrb.gmra.mxu3 %vm141_vm11, %v3257_v1 }
 0x593   :  { %2523 = vmatmul.msk.f32.vlgmr.msrb.gmra.mxu0 %vm141_vm11, %v3270_v8  ;;  %2524 = vmatmul.msk.f32.vlgmr.msrb.gmra.mxu1 %vm141_vm11, %v3270_v8 }
 0x5b0   :  { %v1280_v51 = vpop.xlane.xlu1 %1279 }
 0x5b1   :  { %v1282_v9 = vmul.f32 0.00390625, %v1280_v51 }
 0x5d0   :  { %v1275_v21 = vpop.xlane.xlu2 %1274 }
 0x5d1   :  { %v1281_v5 = vmul.f32 0.00390625, %v1275_v21 }
 0x5d3   :  { %v1283_v29 = vmul.f32 %v1281_v5, %v1281_v5 }
 0x5d5   :  { %v1284_v20 = vsub.f32 %v1282_v9, %v1283_v29 }
 0x5d7   :  { %v1285_v8 = vadd.f32 1e-05, %v1284_v20  ;;  %v2741_v20 = vld [vmem:[%s3465_s0 + $0x8] sm:$0xff] }
 0x5d9   :  { %2736 = vrsqrt.f32 %v1285_v8  ;;  %vm1292_vm4 = vweird.f32 %v1285_v8 }
 0x5de   :  { %v1904_v55 = vpop.f32.mrf.mxu2 }
 0x5df   :  { %v2737_v24 = vpop.eup %2736 }
 0x5e0   :  { %v1287_v34 = vmul.f32 %v2737_v24, %v1285_v8  ;;  %vm1293_vm3 = vweird.f32 %v2737_v24 }
 0x5e1   :  { %vm1294_vm5 = vmor %vm1292_vm4, %vm1293_vm3 }
 0x5e2   :  { %v1288_v63 = vmul.f32 %v2737_v24, %v1287_v34 }
 0x5e4   :  { %v1924_v39 = vpop.f32.mrf.mxu3  ;;  %v1289_v60 = vmul.f32 0.5, %v1288_v63 }
 0x5e6   :  { %v1290_v46 = vsub.f32 1.5, %v1289_v60 }
 0x5e8   :  { %v1291_v53 = vmul.f32 %v2737_v24, %v1290_v46 }
 0x5ea   :  { %v1295_v13 = vsel %vm1294_vm5, %v2737_v24, %v1291_v53 }
 0x5eb   :  { %v1296_v17 = vmul.f32 %v1295_v13, %v104_v10 }
 0x5ed   :  { %v1297_v35 = vmul.f32 %v1296_v17, %v1281_v5 }
 0x5ee   :  { %v2013_v40 = vpop.f32.mrf.mxu2 }
 0x5ef   :  { %v1298_v33 = vsub.f32 %v105_v6, %v1297_v35 }
 0x5f0   :  { %v1957_v25 = vpop.f32.mrf.mxu0  ;;  %v1977_v22 = vpop.f32.mrf.mxu1 }
 0x5f1   :  { %v1958_v19 = vadd.f32 %v1957_v25, %v1904_v55  ;;  %v1978_v44 = vadd.f32 %v1977_v22, %v1924_v39 }
 0x5f3   :  { %v2033_v26 = vpop.f32.mrf.mxu3  ;;  %v2036_v62 = vadd.f32 %v2013_v40, %v1958_v19 }
 0x5f4   :  { %v2037_v15 = vadd.f32 %v2033_v26, %v1978_v44 }
 0x5f7   :  { %v2113_v58 = vpop.f32.mrf.mxu2 }
 0x5f8   :  { %v2071_v1 = vpop.f32.mrf.mxu0 }
 0x5f9   :  { %v2094_v27 = vadd.f32 %v2071_v1, %v2036_v62  ;;  %v2740_v1 = vld [vmem:[%s3465_s0] sm:$0xff] }
 0x5fb   :  { %v2133_v23 = vpop.f32.mrf.mxu3  ;;  %v2136_v41 = vadd.f32 %v2113_v58, %v2094_v27 }
 0x5fe   :  { %v2091_v38 = vpop.f32.mrf.mxu1 }
 0x5ff   :  { %v2232_v36 = vpop.f32.mrf.mxu2  ;;  %v2095_v28 = vadd.f32 %v2091_v38, %v2037_v15 }
 0x601   :  { %v2137_v31 = vadd.f32 %v2133_v23, %v2095_v28 }
 0x603   :  { %v2252_v37 = vpop.f32.mrf.mxu3 }
 0x607   :  { %v2345_v49 = vpop.f32.mrf.mxu2 }
 0x608   :  { %v2174_v7 = vpop.f32.mrf.mxu0  ;;  %v2194_v11 = vpop.f32.mrf.mxu1 }
 0x609   :  { %v2197_v48 = vadd.f32 %v2174_v7, %v2136_v41  ;;  %v2198_v56 = vadd.f32 %v2194_v11, %v2137_v31  ;;  %v2742_v41 = vld [vmem:[%s3465_s0 + $0x10] sm:$0xff] }
 0x60b   :  { %v2255_v16 = vadd.f32 %v2232_v36, %v2197_v48  ;;  %v2256_v45 = vadd.f32 %v2252_v37, %v2198_v56  ;;  %v2743_v48 = vld [vmem:[%s3465_s0 + $0x18] sm:$0xff] }
 0x610   :  { %v2287_v50 = vpop.f32.mrf.mxu0  ;;  %v2307_v52 = vpop.f32.mrf.mxu1 }
 0x611   :  { %v2310_v57 = vadd.f32 %v2287_v50, %v2255_v16  ;;  %v2311_v18 = vadd.f32 %v2307_v52, %v2256_v45 }
 0x613   :  { %v2368_v61 = vadd.f32 %v2345_v49, %v2310_v57 }
 0x614   :  { %v2365_v14 = vpop.f32.mrf.mxu3 }
 0x615   :  { %v2369_v42 = vadd.f32 %v2365_v14, %v2311_v18  ;;  %v2373_v30 = vmul.f32 %v2368_v61, %v2368_v61 }
 0x617   :  { %v2370_v54 = vadd.f32 %v2369_v42, %v2368_v61  ;;  %v2374_v32 = vmul.f32 %v2369_v42, %v2369_v42 }
 0x619   :  { %2371 = vadd.xlane.f32.xlu0 %v2370_v54  ;;  %v2375_v47 = vadd.f32 %v2374_v32, %v2373_v30 }
 0x61b   :  { %2376 = vadd.xlane.f32.xlu2 %v2375_v47 }
 0x62d   :  { %1301 = vperm.xlu0 %2609, %v1296_v17  }
 0x633   :  { %1308 = vperm.xlu2 %2690, %v1298_v33  }
 0x68c   :  { %v2372_v4 = vpop.xlane.xlu0 %2371 }
 0x68d   :  { %v2378_v0 = vmul.f32 0.00390625, %v2372_v4 }
 0x68e   :  { %v2377_v43 = vpop.xlane.xlu2 %2376 }
 0x68f   :  { %v2380_v12 = vmul.f32 %v2378_v0, %v2378_v0  ;;  %v2379_v59 = vmul.f32 0.00390625, %v2377_v43 }
 0x691   :  { %v2381_v55 = vsub.f32 %v2379_v59, %v2380_v12 }
 0x693   :  { %v2382_v39 = vadd.f32 1e-05, %v2381_v55 }
 0x695   :  { %2738 = vrsqrt.f32 %v2382_v39  ;;  %vm2389_vm7 = vweird.f32 %v2382_v39 }
 0x696   :  { %v1309_v29 = vpop.permute.xlu2 %1308 }
 0x69b   :  { %v2739_v40 = vpop.eup %2738 }
 0x69c   :  { %v2384_v21 = vmul.f32 %v2739_v40, %v2382_v39  ;;  %vm2390_vm6 = vweird.f32 %v2739_v40 }
 0x69d   :  { %vm2391_vm8 = vmor %vm2389_vm7, %vm2390_vm6 }
 0x69e   :  { %v2385_v25 = vmul.f32 %v2739_v40, %v2384_v21 }
 0x69f   :  { %v1302_v22 = vpop.permute.xlu0 %1301 }
 0x6a0   :  { %v2386_v5 = vmul.f32 0.5, %v2385_v25  ;;  %v1304_v51 = vmul.f32 %v1302_v22, %v3330_v2  ;;  %v1305_v26 = vmul.f32 %v1302_v22, %v3332_v3 }
 0x6a2   :  { %v2387_v19 = vsub.f32 1.5, %v2386_v5  ;;  %v1311_v58 = vadd.f32 %v1309_v29, %v1304_v51  ;;  %v1312_v9 = vadd.f32 %v1309_v29, %v1305_v26 }
 0x6a4   :  { %v1313_v38 = vadd.f32 %v2740_v1, %v1311_v58  ;;  %v1314_v44 = vadd.f32 %v2741_v20, %v1312_v9  ;;  %v2388_v62 = vmul.f32 %v2739_v40, %v2387_v19 }
 0x6a6   :  { %1315 = vst [vmem:[#allocation3] sm:$0xff] %v1313_v38  ;;  %v2392_v2 = vsel %vm2391_vm8, %v2739_v40, %v2388_v62 }
 0x6a7   :  { %1316 = vst [vmem:[#allocation3 + $0x8] sm:$0xff] %v1314_v44  ;;  %v2393_v3 = vmul.f32 %v2392_v2, %v104_v10 }
 0x6a9   :  { %2398 = vperm.xlu1 %2731, %v2393_v3   ;;  %v2394_v23 = vmul.f32 %v2393_v3, %v2378_v0 }
 0x6ab   :  { %v2395_v8 = vsub.f32 %v105_v6, %v2394_v23 }
 0x6ad   :  { %2405 = vperm.xlu0 %2609, %v2395_v8  }
 0x71b   :  { %v2399_v15 = vpop.permute.xlu1 %2398 }
 0x71c   :  { %v2401_v27 = vmul.f32 %v2399_v15, %v2368_v61  ;;  %v2402_v36 = vmul.f32 %v2399_v15, %v2369_v42 }
 0x71f   :  { %v2406_v28 = vpop.permute.xlu0 %2405 }
 0x720   :  { %v2408_v7 = vadd.f32 %v2406_v28, %v2401_v27  ;;  %v2409_v11 = vadd.f32 %v2406_v28, %v2402_v36 }
 0x722   :  { %v2410_v31 = vadd.f32 %v2742_v41, %v2408_v7  ;;  %v2411_v37 = vadd.f32 %v2743_v48, %v2409_v11 }
 0x724   :  { %2413 = vst [vmem:[#allocation3 + $0x10] sm:$0xff] %v2410_v31 }
 0x725   :  { %2414 = vst [vmem:[#allocation3 + $0x18] sm:$0xff] %v2411_v37 }
 0x726   :  { %2427 = dma.vmem_to_hbm [thread:$0]  %s2420_s23, 512, %s2422_s21, [#allocation4], %s2781_s13, %s2781_s13, %s2777_s11  }
 0x727   :  { %2768 = dma.done.wait [#allocation4], 512  }
 0x728   :  { %2769 = vsyncadd [#allocation4], 4294966784 }
 0x729   :  { %2432 = vsyncpa [#allocation4], 1 }

</bundles_post_ra>
